<compile_context>
chip_gen: v5e
topology: v5e:2x2
jax: 0.10.0
libtpu: 0.0.40
codegen_flags: <defaults>
</compile_context>

<pallas_src>
import functools
import math

import jax
import jax.numpy as jnp
from jax.experimental import pallas as pl
from jax.experimental.pallas import tpu as pltpu


def _round_up(x, m):
    return ((x + m - 1) // m) * m


def _block_kernel(cp_ref, w1_ref, w2_ref, aw_ref, r_ref, g_ref,
                  audio_ref, cp_out_ref, x_sc, carry_sc, *, sub):
    c = pl.program_id(0)

    # Carry init once (chunk 0).  r/g are precomputed in XLA and VMEM-resident.
    @pl.when(c == 0)
    def _init():
        carry_sc[...] = jnp.zeros_like(carry_sc)

    r = r_ref[...]                                   # (D, 1), in (base_resonance, 1)
    g = g_ref[...]                                   # (D, 1)
    w2 = w2_ref[...]                                 # (D, D)
    aw = aw_ref[...]                                 # (D, D)

    Fc = cp_ref.shape[1]
    n_sub = Fc // sub

    # Hoisted: x = mapping @ control_plane over the whole DMA'd chunk (MXU),
    # stored to VMEM scratch so the sub-tile loop only keeps (D, SUB) live.
    x_sc[...] = jnp.dot(w1_ref[...], cp_ref[...], preferred_element_type=jnp.float32)

    # (1, SUB) lane index; broadcasts against (D, SUB) in the scan masks.
    lane = jax.lax.broadcasted_iota(jnp.int32, (1, sub), 1)

    def body(j, carry):
        start = pl.multiple_of(j * sub, sub)
        xs = x_sc[:, pl.ds(start, sub)]              # (D, SUB) == orig for this sub-tile

        # fft_convolve(x, cumprod(decays)) == causal first-order IIR:
        #   y[d, t] = r_d * (x[d, t] + y[d, t-1])
        # Hillis-Steele log-doubling scan along the lane axis; the carry
        # y[d, start - 1] from the previous sub-tile/chunk is folded into lane 0.
        z = r * xs
        z = jnp.where(lane == 0, z + r * carry_sc[...], z)
        p = r
        s = 1
        while s < sub:                               # unrolled at trace time: log2(SUB) steps
            shifted = pltpu.roll(z, shift=s, axis=1) # shifted[:, t] = z[:, t - s] (wraps)
            z = z + p * jnp.where(lane >= s, shifted, 0.0)
            p = p * p
            s *= 2
        carry_sc[...] = z[:, sub - 1:sub]            # carry for the next sub-tile / chunk

        # x = out_mapping @ y + orig            (s2 -> w2 substitution, see header)
        x2 = jnp.dot(w2, z, preferred_element_type=jnp.float32) + xs
        cp_new = jnp.tanh(x2 * g)                    # cp = tanh(x * gains)
        audio = jnp.dot(aw, cp_new, preferred_element_type=jnp.float32)

        # Lane-dense stores (full 128-lane vst); permute happens in XLA wrapper.
        cp_out_ref[:, pl.ds(start, sub)] = cp_new.astype(cp_out_ref.dtype)
        audio_ref[:, pl.ds(start, sub)] = audio.astype(audio_ref.dtype)
        return carry

    jax.lax.fori_loop(0, n_sub, body, None, unroll=(n_sub <= 8))


def block_forward(cp, w1, w2, audio_w, decays, gains,
                  base_resonance=0.5, max_gain=5.0,
                  frame_chunk=2048, sub=256):
    """Pallas-backed equivalent of Block.forward.  Returns (audio, cp)."""
    B, D, F = cp.shape
    assert B == 1, "decays.view(B, D, 1) requires block_size == B*D, i.e. B == 1"
    assert decays.size == D and gains.size == D, "decays/gains must have block_size elements"
    assert sub % 128 == 0, "scan sub-tile must be lane-dense (multiple of 128)"
    assert frame_chunk % sub == 0, "frame_chunk must be a multiple of the scan sub-tile"

    # Lane-dense layout: frames on the 128-lane axis, zero-padded to a whole
    # number of chunks (the IIR is causal, so padded frames never affect the
    # first F outputs and are sliced off afterwards).
    Fc = min(frame_chunk, _round_up(F, sub))
    F_pad = _round_up(F, Fc)
    n_chunks = F_pad // Fc

    cp2 = cp[0].astype(jnp.float32)
    if F_pad != F:
        cp2 = jnp.pad(cp2, ((0, 0), (0, F_pad - F)))

    # Parameter transforms precomputed in XLA (data-independent, D elements).
    r = (base_resonance
         + jax.nn.sigmoid(decays.reshape(D, 1).astype(jnp.float32))
         * (1.0 - base_resonance))
    g = jax.nn.sigmoid(gains.reshape(D, 1).astype(jnp.float32)) * max_gain

    kernel = functools.partial(_block_kernel, sub=sub)

    def resident(shape):                       # same block every grid step -> VMEM-resident
        return pl.BlockSpec(shape, lambda c: (0, 0))

    log2_sub = int(math.log2(sub))
    cost = pl.CostEstimate(
        flops=int(3 * 2 * D * D * F_pad + 2 * D * F_pad * (2 * log2_sub + 4)),
        transcendentals=int(D * F_pad),
        bytes_accessed=int(4 * (3 * D * F_pad + 3 * D * D + 2 * D)),
    )

    audio_dc, cp_out2 = pl.pallas_call(
        kernel,
        grid=(n_chunks,),
        in_specs=[pl.BlockSpec((D, Fc), lambda c: (0, c)),    # control plane chunk
                  resident((D, D)),                           # w1 (mapping)
                  resident((D, D)),                           # w2 (out_mapping)
                  resident((D, D)),                           # audio mapping
                  resident((D, 1)),                           # resonance r
                  resident((D, 1))],                          # gains g
        out_specs=(pl.BlockSpec((D, Fc), lambda c: (0, c)),   # audio, lane-dense (D, F)
                   pl.BlockSpec((D, Fc), lambda c: (0, c))),  # new control plane
        out_shape=(jax.ShapeDtypeStruct((D, F_pad), jnp.float32),
                   jax.ShapeDtypeStruct((D, F_pad), jnp.float32)),
        scratch_shapes=[pltpu.VMEM((D, Fc), jnp.float32),     # hoisted x = w1 @ cp
                        pltpu.VMEM((D, 1), jnp.float32)],     # IIR carry across sub-tiles/chunks
        compiler_params=pltpu.CompilerParams(
            # MUST stay "arbitrary": the chunk axis carries the IIR scan state
            # through VMEM scratch; marking it "parallel" breaks the carry chain.
            dimension_semantics=("arbitrary",)),
        cost_estimate=cost,
    )(cp2, w1.astype(jnp.float32), w2.astype(jnp.float32),
      audio_w.astype(jnp.float32), r, g)

    cp_out = cp_out2[:, :F][None]                             # (1, D, F)
    # permute(0, 2, 1).reshape(B, 1, -1) done in XLA on the lane-dense result.
    audio = jnp.transpose(audio_dc[:, :F]).reshape(B, 1, F * D)
    return audio, cp_out


def block_forward_ref(cp, w1, w2, audio_w, decays, gains,
                      base_resonance=0.5, max_gain=5.0):
    """Pure-JAX reference with identical math (for verification)."""
    B, D, F = cp.shape
    hp = jax.lax.Precision.HIGHEST
    r = base_resonance + jax.nn.sigmoid(decays) * (1.0 - base_resonance)        # (D,)
    g = jax.nn.sigmoid(gains) * max_gain
    x = jnp.einsum('ij,bjf->bif', w1, cp, precision=hp)
    orig = x
    t = jnp.arange(F)[:, None]
    k = jnp.arange(F)[None, :]
    toep = jnp.where(t >= k, r[:, None, None] ** (t - k + 1).astype(jnp.float32), 0.0)
    y = jnp.einsum('dtk,bdk->bdt', toep, x, precision=hp)
    x2 = jnp.einsum('ij,bjf->bif', w2, y, precision=hp) + orig
    cp_new = jnp.tanh(x2 * g[None, :, None])
    audio = jnp.einsum('ij,bjf->bif', audio_w, cp_new, precision=hp)
    audio = jnp.transpose(audio, (0, 2, 1)).reshape(B, 1, -1)
    return audio, cp_new


if __name__ == "__main__":
    # batch, block_size (=control_plane_dim), frames.  frame_chunk=512 / sub=256
    # exercises multi-chunk grid carry, multi-sub-tile carry, and tail padding.
    B, D, F = 1, 16, 768
    key = jax.random.PRNGKey(0)
    ks = jax.random.split(key, 6)

    # deterministic parameter init mirroring Block.__init__
    w1 = jax.random.uniform(ks[0], (D, D), jnp.float32, -1.0, 1.0)
    w2 = jax.random.uniform(ks[1], (D, D), jnp.float32, -1.0, 1.0)
    audio_w = jax.random.uniform(ks[2], (D, D), jnp.float32, -1.0, 1.0)
    decays = jax.random.uniform(ks[3], (D,), jnp.float32, 0.001, 0.99)
    gains = jax.random.uniform(ks[4], (D,), jnp.float32, 0.0, 1.0)
    cp_in = jax.random.uniform(ks[5], (B, D, F), jnp.float32, -1.0, 1.0)

    audio, cp_out = block_forward(cp_in, w1, w2, audio_w, decays, gains,
                                  frame_chunk=512, sub=256)
    jax.block_until_ready((audio, cp_out))

    audio_ref, cp_ref = block_forward_ref(cp_in, w1, w2, audio_w, decays, gains)

    assert audio.shape == (B, 1, D * F)
    assert cp_out.shape == (B, D, F)
    if not (jnp.allclose(audio, audio_ref, rtol=1e-2, atol=1e-2) and
            jnp.allclose(cp_out, cp_ref, rtol=1e-2, atol=1e-2)):
        raise AssertionError("Pallas kernel output mismatch vs JAX reference")

    print("KERNEL_OK")
</pallas_src>

<mosaic_0001>
module attributes {stable_mosaic.version = 11 : i64} {
  func.func @_block_kernel(%arg0: i32, %arg1: memref<16x512xf32, #tpu.memory_space<vmem>>, %arg2: memref<16x16xf32, #tpu.memory_space<vmem>>, %arg3: memref<16x16xf32, #tpu.memory_space<vmem>>, %arg4: memref<16x16xf32, #tpu.memory_space<vmem>>, %arg5: memref<16x1xf32, #tpu.memory_space<vmem>>, %arg6: memref<16x1xf32, #tpu.memory_space<vmem>>, %arg7: memref<16x512xf32, #tpu.memory_space<vmem>>, %arg8: memref<16x512xf32, #tpu.memory_space<vmem>>, %arg9: memref<16x512xf32, #tpu.memory_space<vmem>>, %arg10: memref<16x1xf32, #tpu.memory_space<vmem>>) attributes {dimension_semantics = [#tpu.dimension_semantics<arbitrary>], iteration_bounds = array<i64: 2>, scalar_prefetch = 0 : i64, scratch_operands = 2 : i64, tpu.core_type = #tpu.core_type<tc>, window_params = [{transform_indices = @transform_0, window_bounds = array<i64: 16, 512>}, {pipeline_mode = #tpu.pipeline_mode<synchronous>, transform_indices = @transform_1, window_bounds = array<i64: 16, 16>}, {pipeline_mode = #tpu.pipeline_mode<synchronous>, transform_indices = @transform_2, window_bounds = array<i64: 16, 16>}, {pipeline_mode = #tpu.pipeline_mode<synchronous>, transform_indices = @transform_3, window_bounds = array<i64: 16, 16>}, {pipeline_mode = #tpu.pipeline_mode<synchronous>, transform_indices = @transform_4, window_bounds = array<i64: 16, 1>}, {pipeline_mode = #tpu.pipeline_mode<synchronous>, transform_indices = @transform_5, window_bounds = array<i64: 16, 1>}, {transform_indices = @transform_6, window_bounds = array<i64: 16, 512>}, {transform_indices = @transform_7, window_bounds = array<i64: 16, 512>}]} {
    %c0_i32 = arith.constant 0 : i32
    %0 = arith.cmpi eq, %arg0, %c0_i32 : i32
    %1 = arith.extui %0 : i1 to i32
    %c0_i32_0 = arith.constant 0 : i32
    %2 = arith.cmpi ne, %1, %c0_i32_0 : i32
    scf.if %2 {
      %cst_78 = arith.constant 0.000000e+00 : f32
      %240 = vector.broadcast %cst_78 : f32 to vector<16x1xf32>
      %c0_79 = arith.constant 0 : index
      %c0_80 = arith.constant 0 : index
      %241 = vector.load %arg10[%c0_79, %c0_80] : memref<16x1xf32, #tpu.memory_space<vmem>>, vector<16x1xf32>
      tpu.vector_store %arg10[%c0_79, %c0_80], %240 {strides = array<i32>} : memref<16x1xf32, #tpu.memory_space<vmem>>, vector<16x1xf32>,
    } else {
    }
    %c0 = arith.constant 0 : index
    %c0_1 = arith.constant 0 : index
    %3 = vector.load %arg5[%c0, %c0_1] : memref<16x1xf32, #tpu.memory_space<vmem>>, vector<16x1xf32>
    %c0_2 = arith.constant 0 : index
    %c0_3 = arith.constant 0 : index
    %4 = vector.load %arg6[%c0_2, %c0_3] : memref<16x1xf32, #tpu.memory_space<vmem>>, vector<16x1xf32>
    %c0_4 = arith.constant 0 : index
    %c0_5 = arith.constant 0 : index
    %5 = vector.load %arg3[%c0_4, %c0_5] : memref<16x16xf32, #tpu.memory_space<vmem>>, vector<16x16xf32>
    %c0_6 = arith.constant 0 : index
    %c0_7 = arith.constant 0 : index
    %6 = vector.load %arg4[%c0_6, %c0_7] : memref<16x16xf32, #tpu.memory_space<vmem>>, vector<16x16xf32>
    %c0_8 = arith.constant 0 : index
    %c0_9 = arith.constant 0 : index
    %7 = vector.load %arg2[%c0_8, %c0_9] : memref<16x16xf32, #tpu.memory_space<vmem>>, vector<16x16xf32>
    %c0_10 = arith.constant 0 : index
    %c0_11 = arith.constant 0 : index
    %8 = vector.load %arg1[%c0_10, %c0_11] : memref<16x512xf32, #tpu.memory_space<vmem>>, vector<16x512xf32>
    %cst = arith.constant dense<0.000000e+00> : vector<16x512xf32>
    %9 = tpu.matmul %7, %8, %cst {dimension_numbers = #tpu.dot_dimension_numbers<[1], [0], [0], [1], [0, 0, 1, 1], [], []>} : vector<16x16xf32>, vector<16x512xf32>, vector<16x512xf32> -> vector<16x512xf32>
    %c0_12 = arith.constant 0 : index
    %c0_13 = arith.constant 0 : index
    %10 = vector.load %arg9[%c0_12, %c0_13] : memref<16x512xf32, #tpu.memory_space<vmem>>, vector<16x512xf32>
    tpu.vector_store %arg9[%c0_12, %c0_13], %9 {strides = array<i32>} : memref<16x512xf32, #tpu.memory_space<vmem>>, vector<16x512xf32>,
    %11 = tpu.iota {dimensions = array<i32: 1>} : vector<1x256xi32>
    %c0_i32_14 = arith.constant 0 : i32
    %c256_i32 = arith.constant 256 : i32
    %12 = arith.muli %c0_i32_14, %c256_i32 : i32
    %13 = tpu.assume_multiple %12, 256 : i32
    %c0_15 = arith.constant 0 : index
    %14 = arith.index_cast %13 : i32 to index
    %15 = vector.load %arg9[%c0_15, %14] : memref<16x512xf32, #tpu.memory_space<vmem>>, vector<16x256xf32>
    %16 = vector.broadcast %3 : vector<16x1xf32> to vector<16x256xf32>
    %17 = arith.mulf %16, %15 : vector<16x256xf32>
    %c0_i32_16 = arith.constant 0 : i32
    %18 = vector.broadcast %c0_i32_16 : i32 to vector<1x256xi32>
    %19 = arith.cmpi eq, %11, %18 : vector<1x256xi32>
    %c0_17 = arith.constant 0 : index
    %c0_18 = arith.constant 0 : index
    %20 = vector.load %arg10[%c0_17, %c0_18] : memref<16x1xf32, #tpu.memory_space<vmem>>, vector<16x1xf32>
    %21 = arith.mulf %3, %20 : vector<16x1xf32>
    %22 = vector.broadcast %21 : vector<16x1xf32> to vector<16x256xf32>
    %23 = arith.addf %17, %22 : vector<16x256xf32>
    %24 = vector.shape_cast %19 : vector<1x256xi1> to vector<1x256xi1>
    %25 = vector.broadcast %24 : vector<1x256xi1> to vector<16x256xi1>
    %26 = arith.select %25, %23, %17 : vector<16x256xi1>, vector<16x256xf32>
    %c1_i32 = arith.constant 1 : i32
    %27 = tpu.dynamic_rotate %26 by %c1_i32 dim 1 : vector<16x256xf32>, i32 -> vector<16x256xf32>
    %c1_i32_19 = arith.constant 1 : i32
    %28 = vector.broadcast %c1_i32_19 : i32 to vector<1x256xi32>
    %29 = arith.cmpi sge, %11, %28 : vector<1x256xi32>
    %cst_20 = arith.constant 0.000000e+00 : f32
    %30 = vector.shape_cast %29 : vector<1x256xi1> to vector<1x256xi1>
    %31 = vector.broadcast %30 : vector<1x256xi1> to vector<16x256xi1>
    %32 = vector.broadcast %cst_20 : f32 to vector<16x256xf32>
    %33 = arith.select %31, %27, %32 : vector<16x256xi1>, vector<16x256xf32>
    %34 = vector.broadcast %3 : vector<16x1xf32> to vector<16x256xf32>
    %35 = arith.mulf %34, %33 : vector<16x256xf32>
    %36 = arith.addf %26, %35 : vector<16x256xf32>
    %37 = arith.mulf %3, %3 : vector<16x1xf32>
    %c2_i32 = arith.constant 2 : i32
    %38 = tpu.dynamic_rotate %36 by %c2_i32 dim 1 : vector<16x256xf32>, i32 -> vector<16x256xf32>
    %c2_i32_21 = arith.constant 2 : i32
    %39 = vector.broadcast %c2_i32_21 : i32 to vector<1x256xi32>
    %40 = arith.cmpi sge, %11, %39 : vector<1x256xi32>
    %cst_22 = arith.constant 0.000000e+00 : f32
    %41 = vector.shape_cast %40 : vector<1x256xi1> to vector<1x256xi1>
    %42 = vector.broadcast %41 : vector<1x256xi1> to vector<16x256xi1>
    %43 = vector.broadcast %cst_22 : f32 to vector<16x256xf32>
    %44 = arith.select %42, %38, %43 : vector<16x256xi1>, vector<16x256xf32>
    %45 = vector.broadcast %37 : vector<16x1xf32> to vector<16x256xf32>
    %46 = arith.mulf %45, %44 : vector<16x256xf32>
    %47 = arith.addf %36, %46 : vector<16x256xf32>
    %48 = arith.mulf %37, %37 : vector<16x1xf32>
    %c4_i32 = arith.constant 4 : i32
    %49 = tpu.dynamic_rotate %47 by %c4_i32 dim 1 : vector<16x256xf32>, i32 -> vector<16x256xf32>
    %c4_i32_23 = arith.constant 4 : i32
    %50 = vector.broadcast %c4_i32_23 : i32 to vector<1x256xi32>
    %51 = arith.cmpi sge, %11, %50 : vector<1x256xi32>
    %cst_24 = arith.constant 0.000000e+00 : f32
    %52 = vector.shape_cast %51 : vector<1x256xi1> to vector<1x256xi1>
    %53 = vector.broadcast %52 : vector<1x256xi1> to vector<16x256xi1>
    %54 = vector.broadcast %cst_24 : f32 to vector<16x256xf32>
    %55 = arith.select %53, %49, %54 : vector<16x256xi1>, vector<16x256xf32>
    %56 = vector.broadcast %48 : vector<16x1xf32> to vector<16x256xf32>
    %57 = arith.mulf %56, %55 : vector<16x256xf32>
    %58 = arith.addf %47, %57 : vector<16x256xf32>
    %59 = arith.mulf %48, %48 : vector<16x1xf32>
    %c8_i32 = arith.constant 8 : i32
    %60 = tpu.dynamic_rotate %58 by %c8_i32 dim 1 : vector<16x256xf32>, i32 -> vector<16x256xf32>
    %c8_i32_25 = arith.constant 8 : i32
    %61 = vector.broadcast %c8_i32_25 : i32 to vector<1x256xi32>
    %62 = arith.cmpi sge, %11, %61 : vector<1x256xi32>
    %cst_26 = arith.constant 0.000000e+00 : f32
    %63 = vector.shape_cast %62 : vector<1x256xi1> to vector<1x256xi1>
    %64 = vector.broadcast %63 : vector<1x256xi1> to vector<16x256xi1>
    %65 = vector.broadcast %cst_26 : f32 to vector<16x256xf32>
    %66 = arith.select %64, %60, %65 : vector<16x256xi1>, vector<16x256xf32>
    %67 = vector.broadcast %59 : vector<16x1xf32> to vector<16x256xf32>
    %68 = arith.mulf %67, %66 : vector<16x256xf32>
    %69 = arith.addf %58, %68 : vector<16x256xf32>
    %70 = arith.mulf %59, %59 : vector<16x1xf32>
    %c16_i32 = arith.constant 16 : i32
    %71 = tpu.dynamic_rotate %69 by %c16_i32 dim 1 : vector<16x256xf32>, i32 -> vector<16x256xf32>
    %c16_i32_27 = arith.constant 16 : i32
    %72 = vector.broadcast %c16_i32_27 : i32 to vector<1x256xi32>
    %73 = arith.cmpi sge, %11, %72 : vector<1x256xi32>
    %cst_28 = arith.constant 0.000000e+00 : f32
    %74 = vector.shape_cast %73 : vector<1x256xi1> to vector<1x256xi1>
    %75 = vector.broadcast %74 : vector<1x256xi1> to vector<16x256xi1>
    %76 = vector.broadcast %cst_28 : f32 to vector<16x256xf32>
    %77 = arith.select %75, %71, %76 : vector<16x256xi1>, vector<16x256xf32>
    %78 = vector.broadcast %70 : vector<16x1xf32> to vector<16x256xf32>
    %79 = arith.mulf %78, %77 : vector<16x256xf32>
    %80 = arith.addf %69, %79 : vector<16x256xf32>
    %81 = arith.mulf %70, %70 : vector<16x1xf32>
    %c32_i32 = arith.constant 32 : i32
    %82 = tpu.dynamic_rotate %80 by %c32_i32 dim 1 : vector<16x256xf32>, i32 -> vector<16x256xf32>
    %c32_i32_29 = arith.constant 32 : i32
    %83 = vector.broadcast %c32_i32_29 : i32 to vector<1x256xi32>
    %84 = arith.cmpi sge, %11, %83 : vector<1x256xi32>
    %cst_30 = arith.constant 0.000000e+00 : f32
    %85 = vector.shape_cast %84 : vector<1x256xi1> to vector<1x256xi1>
    %86 = vector.broadcast %85 : vector<1x256xi1> to vector<16x256xi1>
    %87 = vector.broadcast %cst_30 : f32 to vector<16x256xf32>
    %88 = arith.select %86, %82, %87 : vector<16x256xi1>, vector<16x256xf32>
    %89 = vector.broadcast %81 : vector<16x1xf32> to vector<16x256xf32>
    %90 = arith.mulf %89, %88 : vector<16x256xf32>
    %91 = arith.addf %80, %90 : vector<16x256xf32>
    %92 = arith.mulf %81, %81 : vector<16x1xf32>
    %c64_i32 = arith.constant 64 : i32
    %93 = tpu.dynamic_rotate %91 by %c64_i32 dim 1 : vector<16x256xf32>, i32 -> vector<16x256xf32>
    %c64_i32_31 = arith.constant 64 : i32
    %94 = vector.broadcast %c64_i32_31 : i32 to vector<1x256xi32>
    %95 = arith.cmpi sge, %11, %94 : vector<1x256xi32>
    %cst_32 = arith.constant 0.000000e+00 : f32
    %96 = vector.shape_cast %95 : vector<1x256xi1> to vector<1x256xi1>
    %97 = vector.broadcast %96 : vector<1x256xi1> to vector<16x256xi1>
    %98 = vector.broadcast %cst_32 : f32 to vector<16x256xf32>
    %99 = arith.select %97, %93, %98 : vector<16x256xi1>, vector<16x256xf32>
    %100 = vector.broadcast %92 : vector<16x1xf32> to vector<16x256xf32>
    %101 = arith.mulf %100, %99 : vector<16x256xf32>
    %102 = arith.addf %91, %101 : vector<16x256xf32>
    %103 = arith.mulf %92, %92 : vector<16x1xf32>
    %c128_i32 = arith.constant 128 : i32
    %104 = tpu.dynamic_rotate %102 by %c128_i32 dim 1 : vector<16x256xf32>, i32 -> vector<16x256xf32>
    %c128_i32_33 = arith.constant 128 : i32
    %105 = vector.broadcast %c128_i32_33 : i32 to vector<1x256xi32>
    %106 = arith.cmpi sge, %11, %105 : vector<1x256xi32>
    %cst_34 = arith.constant 0.000000e+00 : f32
    %107 = vector.shape_cast %106 : vector<1x256xi1> to vector<1x256xi1>
    %108 = vector.broadcast %107 : vector<1x256xi1> to vector<16x256xi1>
    %109 = vector.broadcast %cst_34 : f32 to vector<16x256xf32>
    %110 = arith.select %108, %104, %109 : vector<16x256xi1>, vector<16x256xf32>
    %111 = vector.broadcast %103 : vector<16x1xf32> to vector<16x256xf32>
    %112 = arith.mulf %111, %110 : vector<16x256xf32>
    %113 = arith.addf %102, %112 : vector<16x256xf32>
    %114 = vector.extract_strided_slice %113 {offsets = [0, 255], sizes = [16, 1], strides = [1, 1]} : vector<16x256xf32> to vector<16x1xf32>
    %c0_35 = arith.constant 0 : index
    %c0_36 = arith.constant 0 : index
    %115 = vector.load %arg10[%c0_35, %c0_36] : memref<16x1xf32, #tpu.memory_space<vmem>>, vector<16x1xf32>
    tpu.vector_store %arg10[%c0_35, %c0_36], %114 {strides = array<i32>} : memref<16x1xf32, #tpu.memory_space<vmem>>, vector<16x1xf32>,
    %cst_37 = arith.constant dense<0.000000e+00> : vector<16x256xf32>
    %116 = tpu.matmul %5, %113, %cst_37 {dimension_numbers = #tpu.dot_dimension_numbers<[1], [0], [0], [1], [0, 0, 1, 1], [], []>} : vector<16x16xf32>, vector<16x256xf32>, vector<16x256xf32> -> vector<16x256xf32>
    %117 = arith.addf %116, %15 : vector<16x256xf32>
    %118 = vector.broadcast %4 : vector<16x1xf32> to vector<16x256xf32>
    %119 = arith.mulf %117, %118 : vector<16x256xf32>
    %120 = math.tanh %119 : vector<16x256xf32>
    %cst_38 = arith.constant dense<0.000000e+00> : vector<16x256xf32>
    %121 = tpu.matmul %6, %120, %cst_38 {dimension_numbers = #tpu.dot_dimension_numbers<[1], [0], [0], [1], [0, 0, 1, 1], [], []>} : vector<16x16xf32>, vector<16x256xf32>, vector<16x256xf32> -> vector<16x256xf32>
    %c0_39 = arith.constant 0 : index
    %122 = arith.index_cast %13 : i32 to index
    %123 = vector.load %arg8[%c0_39, %122] : memref<16x512xf32, #tpu.memory_space<vmem>>, vector<16x256xf32>
    tpu.vector_store %arg8[%c0_39, %122], %120 {strides = array<i32>} : memref<16x512xf32, #tpu.memory_space<vmem>>, vector<16x256xf32>,
    %c0_40 = arith.constant 0 : index
    %124 = arith.index_cast %13 : i32 to index
    %125 = vector.load %arg7[%c0_40, %124] : memref<16x512xf32, #tpu.memory_space<vmem>>, vector<16x256xf32>
    tpu.vector_store %arg7[%c0_40, %124], %121 {strides = array<i32>} : memref<16x512xf32, #tpu.memory_space<vmem>>, vector<16x256xf32>,
    %c1_i32_41 = arith.constant 1 : i32
    %c256_i32_42 = arith.constant 256 : i32
    %126 = arith.muli %c1_i32_41, %c256_i32_42 : i32
    %127 = tpu.assume_multiple %126, 256 : i32
    %c0_43 = arith.constant 0 : index
    %128 = arith.index_cast %127 : i32 to index
    %129 = vector.load %arg9[%c0_43, %128] : memref<16x512xf32, #tpu.memory_space<vmem>>, vector<16x256xf32>
    %130 = vector.broadcast %3 : vector<16x1xf32> to vector<16x256xf32>
    %131 = arith.mulf %130, %129 : vector<16x256xf32>
    %c0_i32_44 = arith.constant 0 : i32
    %132 = vector.broadcast %c0_i32_44 : i32 to vector<1x256xi32>
    %133 = arith.cmpi eq, %11, %132 : vector<1x256xi32>
    %c0_45 = arith.constant 0 : index
    %c0_46 = arith.constant 0 : index
    %134 = vector.load %arg10[%c0_45, %c0_46] : memref<16x1xf32, #tpu.memory_space<vmem>>, vector<16x1xf32>
    %135 = arith.mulf %3, %134 : vector<16x1xf32>
    %136 = vector.broadcast %135 : vector<16x1xf32> to vector<16x256xf32>
    %137 = arith.addf %131, %136 : vector<16x256xf32>
    %138 = vector.shape_cast %133 : vector<1x256xi1> to vector<1x256xi1>
    %139 = vector.broadcast %138 : vector<1x256xi1> to vector<16x256xi1>
    %140 = arith.select %139, %137, %131 : vector<16x256xi1>, vector<16x256xf32>
    %c1_i32_47 = arith.constant 1 : i32
    %141 = tpu.dynamic_rotate %140 by %c1_i32_47 dim 1 : vector<16x256xf32>, i32 -> vector<16x256xf32>
    %c1_i32_48 = arith.constant 1 : i32
    %142 = vector.broadcast %c1_i32_48 : i32 to vector<1x256xi32>
    %143 = arith.cmpi sge, %11, %142 : vector<1x256xi32>
    %cst_49 = arith.constant 0.000000e+00 : f32
    %144 = vector.shape_cast %143 : vector<1x256xi1> to vector<1x256xi1>
    %145 = vector.broadcast %144 : vector<1x256xi1> to vector<16x256xi1>
    %146 = vector.broadcast %cst_49 : f32 to vector<16x256xf32>
    %147 = arith.select %145, %141, %146 : vector<16x256xi1>, vector<16x256xf32>
    %148 = vector.broadcast %3 : vector<16x1xf32> to vector<16x256xf32>
    %149 = arith.mulf %148, %147 : vector<16x256xf32>
    %150 = arith.addf %140, %149 : vector<16x256xf32>
    %151 = arith.mulf %3, %3 : vector<16x1xf32>
    %c2_i32_50 = arith.constant 2 : i32
    %152 = tpu.dynamic_rotate %150 by %c2_i32_50 dim 1 : vector<16x256xf32>, i32 -> vector<16x256xf32>
    %c2_i32_51 = arith.constant 2 : i32
    %153 = vector.broadcast %c2_i32_51 : i32 to vector<1x256xi32>
    %154 = arith.cmpi sge, %11, %153 : vector<1x256xi32>
    %cst_52 = arith.constant 0.000000e+00 : f32
    %155 = vector.shape_cast %154 : vector<1x256xi1> to vector<1x256xi1>
    %156 = vector.broadcast %155 : vector<1x256xi1> to vector<16x256xi1>
    %157 = vector.broadcast %cst_52 : f32 to vector<16x256xf32>
    %158 = arith.select %156, %152, %157 : vector<16x256xi1>, vector<16x256xf32>
    %159 = vector.broadcast %151 : vector<16x1xf32> to vector<16x256xf32>
    %160 = arith.mulf %159, %158 : vector<16x256xf32>
    %161 = arith.addf %150, %160 : vector<16x256xf32>
    %162 = arith.mulf %151, %151 : vector<16x1xf32>
    %c4_i32_53 = arith.constant 4 : i32
    %163 = tpu.dynamic_rotate %161 by %c4_i32_53 dim 1 : vector<16x256xf32>, i32 -> vector<16x256xf32>
    %c4_i32_54 = arith.constant 4 : i32
    %164 = vector.broadcast %c4_i32_54 : i32 to vector<1x256xi32>
    %165 = arith.cmpi sge, %11, %164 : vector<1x256xi32>
    %cst_55 = arith.constant 0.000000e+00 : f32
    %166 = vector.shape_cast %165 : vector<1x256xi1> to vector<1x256xi1>
    %167 = vector.broadcast %166 : vector<1x256xi1> to vector<16x256xi1>
    %168 = vector.broadcast %cst_55 : f32 to vector<16x256xf32>
    %169 = arith.select %167, %163, %168 : vector<16x256xi1>, vector<16x256xf32>
    %170 = vector.broadcast %162 : vector<16x1xf32> to vector<16x256xf32>
    %171 = arith.mulf %170, %169 : vector<16x256xf32>
    %172 = arith.addf %161, %171 : vector<16x256xf32>
    %173 = arith.mulf %162, %162 : vector<16x1xf32>
    %c8_i32_56 = arith.constant 8 : i32
    %174 = tpu.dynamic_rotate %172 by %c8_i32_56 dim 1 : vector<16x256xf32>, i32 -> vector<16x256xf32>
    %c8_i32_57 = arith.constant 8 : i32
    %175 = vector.broadcast %c8_i32_57 : i32 to vector<1x256xi32>
    %176 = arith.cmpi sge, %11, %175 : vector<1x256xi32>
    %cst_58 = arith.constant 0.000000e+00 : f32
    %177 = vector.shape_cast %176 : vector<1x256xi1> to vector<1x256xi1>
    %178 = vector.broadcast %177 : vector<1x256xi1> to vector<16x256xi1>
    %179 = vector.broadcast %cst_58 : f32 to vector<16x256xf32>
    %180 = arith.select %178, %174, %179 : vector<16x256xi1>, vector<16x256xf32>
    %181 = vector.broadcast %173 : vector<16x1xf32> to vector<16x256xf32>
    %182 = arith.mulf %181, %180 : vector<16x256xf32>
    %183 = arith.addf %172, %182 : vector<16x256xf32>
    %184 = arith.mulf %173, %173 : vector<16x1xf32>
    %c16_i32_59 = arith.constant 16 : i32
    %185 = tpu.dynamic_rotate %183 by %c16_i32_59 dim 1 : vector<16x256xf32>, i32 -> vector<16x256xf32>
    %c16_i32_60 = arith.constant 16 : i32
    %186 = vector.broadcast %c16_i32_60 : i32 to vector<1x256xi32>
    %187 = arith.cmpi sge, %11, %186 : vector<1x256xi32>
    %cst_61 = arith.constant 0.000000e+00 : f32
    %188 = vector.shape_cast %187 : vector<1x256xi1> to vector<1x256xi1>
    %189 = vector.broadcast %188 : vector<1x256xi1> to vector<16x256xi1>
    %190 = vector.broadcast %cst_61 : f32 to vector<16x256xf32>
    %191 = arith.select %189, %185, %190 : vector<16x256xi1>, vector<16x256xf32>
    %192 = vector.broadcast %184 : vector<16x1xf32> to vector<16x256xf32>
    %193 = arith.mulf %192, %191 : vector<16x256xf32>
    %194 = arith.addf %183, %193 : vector<16x256xf32>
    %195 = arith.mulf %184, %184 : vector<16x1xf32>
    %c32_i32_62 = arith.constant 32 : i32
    %196 = tpu.dynamic_rotate %194 by %c32_i32_62 dim 1 : vector<16x256xf32>, i32 -> vector<16x256xf32>
    %c32_i32_63 = arith.constant 32 : i32
    %197 = vector.broadcast %c32_i32_63 : i32 to vector<1x256xi32>
    %198 = arith.cmpi sge, %11, %197 : vector<1x256xi32>
    %cst_64 = arith.constant 0.000000e+00 : f32
    %199 = vector.shape_cast %198 : vector<1x256xi1> to vector<1x256xi1>
    %200 = vector.broadcast %199 : vector<1x256xi1> to vector<16x256xi1>
    %201 = vector.broadcast %cst_64 : f32 to vector<16x256xf32>
    %202 = arith.select %200, %196, %201 : vector<16x256xi1>, vector<16x256xf32>
    %203 = vector.broadcast %195 : vector<16x1xf32> to vector<16x256xf32>
    %204 = arith.mulf %203, %202 : vector<16x256xf32>
    %205 = arith.addf %194, %204 : vector<16x256xf32>
    %206 = arith.mulf %195, %195 : vector<16x1xf32>
    %c64_i32_65 = arith.constant 64 : i32
    %207 = tpu.dynamic_rotate %205 by %c64_i32_65 dim 1 : vector<16x256xf32>, i32 -> vector<16x256xf32>
    %c64_i32_66 = arith.constant 64 : i32
    %208 = vector.broadcast %c64_i32_66 : i32 to vector<1x256xi32>
    %209 = arith.cmpi sge, %11, %208 : vector<1x256xi32>
    %cst_67 = arith.constant 0.000000e+00 : f32
    %210 = vector.shape_cast %209 : vector<1x256xi1> to vector<1x256xi1>
    %211 = vector.broadcast %210 : vector<1x256xi1> to vector<16x256xi1>
    %212 = vector.broadcast %cst_67 : f32 to vector<16x256xf32>
    %213 = arith.select %211, %207, %212 : vector<16x256xi1>, vector<16x256xf32>
    %214 = vector.broadcast %206 : vector<16x1xf32> to vector<16x256xf32>
    %215 = arith.mulf %214, %213 : vector<16x256xf32>
    %216 = arith.addf %205, %215 : vector<16x256xf32>
    %217 = arith.mulf %206, %206 : vector<16x1xf32>
    %c128_i32_68 = arith.constant 128 : i32
    %218 = tpu.dynamic_rotate %216 by %c128_i32_68 dim 1 : vector<16x256xf32>, i32 -> vector<16x256xf32>
    %c128_i32_69 = arith.constant 128 : i32
    %219 = vector.broadcast %c128_i32_69 : i32 to vector<1x256xi32>
    %220 = arith.cmpi sge, %11, %219 : vector<1x256xi32>
    %cst_70 = arith.constant 0.000000e+00 : f32
    %221 = vector.shape_cast %220 : vector<1x256xi1> to vector<1x256xi1>
    %222 = vector.broadcast %221 : vector<1x256xi1> to vector<16x256xi1>
    %223 = vector.broadcast %cst_70 : f32 to vector<16x256xf32>
    %224 = arith.select %222, %218, %223 : vector<16x256xi1>, vector<16x256xf32>
    %225 = vector.broadcast %217 : vector<16x1xf32> to vector<16x256xf32>
    %226 = arith.mulf %225, %224 : vector<16x256xf32>
    %227 = arith.addf %216, %226 : vector<16x256xf32>
    %228 = vector.extract_strided_slice %227 {offsets = [0, 255], sizes = [16, 1], strides = [1, 1]} : vector<16x256xf32> to vector<16x1xf32>
    %c0_71 = arith.constant 0 : index
    %c0_72 = arith.constant 0 : index
    %229 = vector.load %arg10[%c0_71, %c0_72] : memref<16x1xf32, #tpu.memory_space<vmem>>, vector<16x1xf32>
    tpu.vector_store %arg10[%c0_71, %c0_72], %228 {strides = array<i32>} : memref<16x1xf32, #tpu.memory_space<vmem>>, vector<16x1xf32>,
    %cst_73 = arith.constant dense<0.000000e+00> : vector<16x256xf32>
    %230 = tpu.matmul %5, %227, %cst_73 {dimension_numbers = #tpu.dot_dimension_numbers<[1], [0], [0], [1], [0, 0, 1, 1], [], []>} : vector<16x16xf32>, vector<16x256xf32>, vector<16x256xf32> -> vector<16x256xf32>
    %231 = arith.addf %230, %129 : vector<16x256xf32>
    %232 = vector.broadcast %4 : vector<16x1xf32> to vector<16x256xf32>
    %233 = arith.mulf %231, %232 : vector<16x256xf32>
    %234 = math.tanh %233 : vector<16x256xf32>
    %cst_74 = arith.constant dense<0.000000e+00> : vector<16x256xf32>
    %235 = tpu.matmul %6, %234, %cst_74 {dimension_numbers = #tpu.dot_dimension_numbers<[1], [0], [0], [1], [0, 0, 1, 1], [], []>} : vector<16x16xf32>, vector<16x256xf32>, vector<16x256xf32> -> vector<16x256xf32>
    %c0_75 = arith.constant 0 : index
    %236 = arith.index_cast %127 : i32 to index
    %237 = vector.load %arg8[%c0_75, %236] : memref<16x512xf32, #tpu.memory_space<vmem>>, vector<16x256xf32>
    tpu.vector_store %arg8[%c0_75, %236], %234 {strides = array<i32>} : memref<16x512xf32, #tpu.memory_space<vmem>>, vector<16x256xf32>,
    %c0_76 = arith.constant 0 : index
    %238 = arith.index_cast %127 : i32 to index
    %239 = vector.load %arg7[%c0_76, %238] : memref<16x512xf32, #tpu.memory_space<vmem>>, vector<16x256xf32>
    tpu.vector_store %arg7[%c0_76, %238], %235 {strides = array<i32>} : memref<16x512xf32, #tpu.memory_space<vmem>>, vector<16x256xf32>,
    %c2_i32_77 = arith.constant 2 : i32
    return
  }
  func.func @transform_0(%arg0: i32) -> (i32, i32) {
    %c0_i32 = arith.constant 0 : i32
    %c0_i32_0 = arith.constant 0 : i32
    return %c0_i32, %arg0 : i32, i32
  }
  func.func @transform_1(%arg0: i32) -> (i32, i32) {
    %c0_i32 = arith.constant 0 : i32
    %c0_i32_0 = arith.constant 0 : i32
    %c0_i32_1 = arith.constant 0 : i32
    return %c0_i32, %c0_i32_0 : i32, i32
  }
  func.func @transform_2(%arg0: i32) -> (i32, i32) {
    %c0_i32 = arith.constant 0 : i32
    %c0_i32_0 = arith.constant 0 : i32
    %c0_i32_1 = arith.constant 0 : i32
    return %c0_i32, %c0_i32_0 : i32, i32
  }
  func.func @transform_3(%arg0: i32) -> (i32, i32) {
    %c0_i32 = arith.constant 0 : i32
    %c0_i32_0 = arith.constant 0 : i32
    %c0_i32_1 = arith.constant 0 : i32
    return %c0_i32, %c0_i32_0 : i32, i32
  }
  func.func @transform_4(%arg0: i32) -> (i32, i32) {
    %c0_i32 = arith.constant 0 : i32
    %c0_i32_0 = arith.constant 0 : i32
    %c0_i32_1 = arith.constant 0 : i32
    return %c0_i32, %c0_i32_0 : i32, i32
  }
  func.func @transform_5(%arg0: i32) -> (i32, i32) {
    %c0_i32 = arith.constant 0 : i32
    %c0_i32_0 = arith.constant 0 : i32
    %c0_i32_1 = arith.constant 0 : i32
    return %c0_i32, %c0_i32_0 : i32, i32
  }
  func.func @transform_6(%arg0: i32) -> (i32, i32) {
    %c0_i32 = arith.constant 0 : i32
    %c0_i32_0 = arith.constant 0 : i32
    return %c0_i32, %arg0 : i32, i32
  }
  func.func @transform_7(%arg0: i32) -> (i32, i32) {
    %c0_i32 = arith.constant 0 : i32
    %c0_i32_0 = arith.constant 0 : i32
    return %c0_i32, %arg0 : i32, i32
  }
}

</mosaic_0001>

<bundles_post_ra>
// kernel: tpu_custom_call.1
= control target key start
LH: loop header
LB: loop body
LE: loop exit
PB: predicated region body
PF: predicated region fallthrough
CT: control target
= control target key end

     0   :  { %s2498_s0 = inlined_call_operand.hbm [shape: f32[16,1024], index: 0, kind: input, shape index: {}]   ;;  %s2499_s1 = inlined_call_operand.vmem [shape: f32[16,16], index: 1, kind: input, shape index: {}]   ;;  %s2500_s2 = inlined_call_operand.vmem [shape: f32[16,16], index: 2, kind: input, shape index: {}]   ;;  %s2501_s3 = inlined_call_operand.hbm [shape: f32[16,16], index: 3, kind: input, shape index: {}]   ;;  %s2502_s4 = inlined_call_operand.vmem [shape: f32[16,1], index: 4, kind: input, shape index: {}]   ;;  %s2503_s5 = inlined_call_operand.vmem [shape: f32[16,1], index: 5, kind: input, shape index: {}]   ;;  %s2504_s6 = inlined_call_operand.hbm [shape: f32[16,1024], index: 6, kind: output, shape index: {0}]   ;;  %s2505_s7 = inlined_call_operand.hbm [shape: f32[16,1024], index: 7, kind: output, shape index: {1}]  }
   0x1   :  { %2509 = sst [smem:[#allocation17_spill]] %s2498_s0 }
   0x2   :  { %2510 = sst [smem:[#allocation18_spill]] %s2501_s3 }
   0x3   :  { %13 = vsyncpa [#allocation5], 0 }
   0x4   :  { %15 = vsyncpa [#allocation5 + $0x1], 0 }
   0x5   :  { %16 = vsyncpa [#allocation8], 0 }
   0x6   :  { %17 = vsyncpa [#allocation6], 0 }
   0x7   :  { %19 = vsyncpa [#allocation6 + $0x1], 0 }
   0x8   :  { %20 = vsyncpa [#allocation11], 0 }
   0x9   :  { %22 = vsyncpa [#allocation11 + $0x1], 0  ;;  %s1830_s24 = smov 0   ;;  %s1832_s25 = smov 0  }
   0xa   :  { %s1834_s26 = smov 0   ;;  %s1836_s27 = smov 0  }
   0xb LB: > { %s1851_s28 = sadd.s32 4294967295, %s1771_s27   ;;  %s1456_s29 = sadd.s32 4294967294, %s1771_s27   ;;  %s1771_s27 = sphi %s1836_s27, %s2528_s27   ;;  %s1767_s26 = sphi %s1834_s26, %s2527_s26   ;;  %s1763_s25 = sphi %s1832_s25, %s2526_s25   ;;  %s1759_s24 = sphi %s1830_s24, %s2525_s24  }
   0xc   : > { %p48_p0 = scmp.ne.s32.totalorder %s1763_s25, %s1759_s24  ;;  %p49_p1 = scmp.eq.s32.totalorder %s1851_s28, 0 }
   0xd   : > { %p177_p2 = scmp.eq.s32.totalorder %s1851_s28, 1  ;;  %p183_p3 = scmp.eq.s32.totalorder %s1456_s29, 1 }
   0xe   : > { %p1860_p4 = por %p49_p1, %p48_p0  ;;  %p1457_p5 = scmp.ge.s32.totalorder %s1771_s27, 1 }
   0xf   : > { %p1865_p6 = por %p183_p3, %p48_p0  ;;  %p216_p7 = scmp.lt.s32.totalorder %s1771_s27, 3 }
  0x10   : > { %s2513_s3 = sld [smem:[#allocation18_spill]]  ;;  %s1773_s13 = smov [#allocation7]  }
  0x11   : > { %p1874_p9 = pnand %p1457_p5, %p216_p7  ;;  %s235_s14 = sshll.u32 %s1773_s13, 4  ;;  %s236_s14 = int_to_ptr.vmem [resolvable:$true] %s235_s14 }
  0x12   : > { %s1884_s15 = sadd.s32 1, %s1771_s27   ;;  %s1774_s16 = smov 128  }
  0x13   : > { %p1522_p10 = pneg %p1874_p9  ;;  %s1775_s17 = smov 8  }
  0x14   : > { %s32_s18 = ssub.s32 %s1771_s27, %s1884_s15  ;;  %s35_s19 = sadd.s32 1, %s1767_s26 }
  0x15   : > { %p1523_p11 = pnand %p1522_p10, %p49_p1  ;;  %p33_p13 = scmp.eq.s32.totalorder %s32_s18, 0 }
  0x16   : > { %s233_s11 = sshll.u32 %s2513_s3, 4  ;;  %p42_p0 = scmp.ne.s32.totalorder %s1767_s26, %s1763_s25  ;;  %s234_s11 = int_to_ptr.hbm [resolvable:$true] %s233_s11 }
  0x17   : > { %1525 = dma.hbm_to_vmem [thread:$0]  (!%p1523_p11), %s234_s11, 256, %s236_s14, [#allocation8], %s1774_s16, %s1774_s16, %s1775_s17  }
  0x18   : > { %p43_p3 = scmp.eq.s32.totalorder %s1771_s27, 0  ;;  %p1538_p5 = scmp.lt.s32.totalorder %s1771_s27, 2 }
  0x19   : > { %s1894_s20 = scalar_select %p33_p13, %s1767_s26, %s35_s19  }
  0x1a   : > { %p44_p7 = por %p43_p3, %p42_p0  ;;  %p1898_p10 = por %p177_p2, %p42_p0 }
  0x1b   : > { %2515 = sst [smem:[#allocation16_spill]] %s1894_s20  ;;  %s255_s22 = sand.u32 1, %s1767_s26  }
  0x1c   : > { %s1509_s23 = sshll.u32 %s1771_s27, 5  ;;  %s1460_s29 = sshll.u32 %s255_s22, 6 }
  0x1d   : > { %s2517_s0 = sld [smem:[#allocation17_spill]]  ;;  %s259_s14 = scalar_lea.vmem [#allocation4], %s1460_s29 }
  0x1e   : > { %s267_s16 = sshll.u32 %s259_s14, 4  ;;  %p1909_p11 = pnand %p1538_p5, %p44_p7  ;;  %s268_s16 = int_to_ptr.vmem [resolvable:$true] %s267_s16 }
  0x1f   : > { %s256_s18 = scalar_lea.sflag [#allocation5], %s255_s22 }
  0x20   : > { %p1643_p13 = pneg %p1909_p11 }
  0x23   : > { %s264_s11 = scalar_lea.hbm %s2517_s0, %s1509_s23  ;;  %s1646_s9 = scalar_lea.hbm %s2517_s0, 128 }
  0x24   : > { %s265_s13 = sshll.u32 %s264_s11, 4  ;;  %s266_s13 = int_to_ptr.hbm [resolvable:$true] %s265_s13 }
  0x25   : > { %s1639_s19 = sshra.s32 %s266_s13, 4  ;;  %s1640_s19 = int_to_ptr.hbm [resolvable:$true] %s1639_s19 }
  0x26   : > { %s1641_s3 = scalar_lea.hbm %s1640_s19, 64  ;;  %p1647_p5 = scmp.lt.s32.totalorder %s1640_s19, %s2517_s0 }
  0x27   : > { %p1642_p2 = scmp.ne.s32.totalorder %s1640_s19, %s1641_s3  ;;  %p1648_p7 = scmp.lt.s32.totalorder %s1646_s9, %s1641_s3 }
  0x29   : > { %p1644_p0 = pnand %p1643_p13, %p1642_p2  ;;  %p1649_p12 = por %p1648_p7, %p1647_p5 }
  0x2b   : > { %p1645_p3 = pneg %p1644_p0 }
  0x2d   : > { %p1650_p8 = pnand %p1649_p12, %p1645_p3 }
  0x2f   : > { %1653 = shalt.err (!%p1650_p8)
}
  0x30   : > { %s1776_s22 = smov 1024   ;;  %s1777_s14 = smov 512  }
  0x31   : > { %s1778_s20 = smov 32   ;;  %279 = sbr.rel (%p1874_p9) target bundleno = 2452 (0x994), region = 44 }
  0x32   : > { %1529 = dma.hbm_to_vmem [thread:$0]  (!%p1909_p11), %s266_s13, 1024, %s268_s16, %s256_s18, %s1776_s22, %s1777_s14, %s1778_s20  }
  0x33   : > { %s1926_s23 = sand.u32 (!%p1874_p9), 1, %s1763_s25  }
  0x34   : > { %s1464_s19 = sshll.u32 (!%p1874_p9), %s1926_s23, 6  ;;  %s282_s3 = scalar_lea.sflag (!%p1874_p9), [#allocation5], %s1926_s23 }
  0x35   : > { %s285_s29 = scalar_lea.vmem (!%p1874_p9), [#allocation4], %s1464_s19 }
  0x36   : > { %1742 = dma.done.wait (%p1860_p4), %s282_s3, 1024  }
  0x37   : > { %1744 = vsyncadd (%p1860_p4), %s282_s3, 4294966272 }
  0x38   : > { %1746 = dma.done.wait (%p49_p1), [#allocation8], 256  }
  0x39   : > { %1748 = vsyncadd (%p49_p1), [#allocation8], 4294967040  ;;  %s1938_s12 = scalar_lea.vmem [#allocation9], %s1464_s19  ;;  %s1940_s20 = scalar_lea.vmem [#allocation10], %s1464_s19 }
  0x3a   : > { %p2519_p8 = scmp.ne.s32.totalorder %s1851_s28, 0 }
  0x3c   : > { %333 = sbr.rel (%p2519_p8) target bundleno = 68 (0x44), region = 56 }
  0x41   : > { %vm334_vm0 = vcmask 7168   ;;  %v1779_v0 = vmov 0.0  }
  0x42   : > { %335 = vst.msk [vmem:[#allocation3] sm:$0xff] %vm334_vm0, %v1779_v0 }
  0x43   : > { %336 = vst.msk [vmem:[#allocation3 + $0x8] sm:$0xff] %vm334_vm0, %v1779_v0 }
  0x44 PF: > { %v351_v1 = vld [vmem:[%s285_s29 + $0x20] sm:$0xff]  ;;  %v352_v2 = vld [vmem:[%s285_s29 + $0x28] sm:$0xff]  ;;  %v353_v3 = vld [vmem:[%s285_s29 + $0x30] sm:$0xff]  ;;  %v1780_v4 = vmov 0   ;;  %vm355_vm1 = vcmask 130048   ;;  %v462_v20 = vlaneseq  ;;  %s1781_s22 = smov 1  }
  0x45   : > { %1590 = vset.pattern.permute.xlu0 %v1780_v4  ;;  %376 = vmatpush.msra.mxu0 %v351_v1  ;;  %v354_v5 = vld [vmem:[%s285_s29 + $0x38] sm:$0xff]  ;;  %v347_v7 = vld [vmem:[%s285_s29] sm:$0xff]  ;;  %v348_v8 = vld [vmem:[%s285_s29 + $0x8] sm:$0xff]  ;;  %s1782_s14 = smov 2   ;;  %s1783_s19 = smov 4  }
  0x46   : > { %v1947_v6 = vld [vmem:[%s2502_s4 + $0x8] sm:$0xff]  ;;  %399 = vmatpush.msra.mxu1 %v352_v2  ;;  %422 = vmatpush.msra.mxu2 %v353_v3  ;;  %v349_v9 = vld [vmem:[%s285_s29 + $0x10] sm:$0xff]  ;;  %v1974_v21 = vand.u32 127, %v462_v20  ;;  %s1784_s3 = smov 8   ;;  %s2507_s30 = smov 32  }
  0x47   : > { %445 = vmatpush.msra.mxu3 %v354_v5  ;;  %1591 = vset.pattern.permute.xlu1 %v1780_v4  ;;  %v350_v10 = vld [vmem:[%s285_s29 + $0x18] sm:$0xff]  ;;  %v345_v13 = vld [vmem:[%s2499_s1] sm:$0xff]  ;;  %v543_v51 = vmul.f32 %v1947_v6, %v1947_v6  ;;  %s1785_s29 = smov 16   ;;  %s1787_s13 = smov 64  }
  0x48   : > { %476 = vperm.xlu0 %1590, %v1947_v6   ;;  %377 = vmatpush.msra.mxu0 %v347_v7  ;;  %v1959_v14 = vld [vmem:[%s2502_s4] sm:$0xff]  ;;  %v346_v17 = vld [vmem:[%s2499_s1 + $0x8] sm:$0xff]  ;;  %vm483_vm2 = vcmp.eq.s32.totalorder %v1974_v21, 0  ;;  %vm519_vm3 = vcmp.lt.s32.totalorder %v1974_v21, 1  ;;  %vm524_vm4 = vcmp.ge.s32.totalorder %v1974_v21, 1  ;;  %vm552_vm5 = vcmp.lt.s32.totalorder %v1974_v21, 2 }
  0x49   : > { %400 = vmatpush.msra.mxu1 %v348_v8  ;;  %423 = vmatpush.msra.mxu2 %v349_v9  ;;  %v485_v15 = vld [vmem:[#allocation3] sm:$0xff]  ;;  %v542_v55 = vmul.f32 %v1959_v14, %v1959_v14  ;;  %vm557_vm6 = vcmp.ge.s32.totalorder %v1974_v21, 2  ;;  %v586_v9 = vmul.f32 %v543_v51, %v543_v51  ;;  %vm595_vm7 = vcmp.lt.s32.totalorder %v1974_v21, 4  ;;  %s1337_s16 = sshll.u32 %s1940_s20, 4  ;;  %s1308_s18 = scalar_lea.sflag [#allocation11], %s1926_s23  ;;  %s1338_s16 = int_to_ptr.vmem [resolvable:$true] %s1337_s16 }
  0x4a   : > { %v486_v11 = vld [vmem:[#allocation3 + $0x8] sm:$0xff]  ;;  %446 = vmatpush.msra.mxu3 %v350_v10  ;;  %1469 = vmatmul.msk.f32.vlgmr.msra.gmra.mxu0 %vm355_vm1, %v345_v13  ;;  %v487_v16 = vmul.f32 %v485_v15, %v1959_v14  ;;  %vm600_vm8 = vcmp.ge.s32.totalorder %v1974_v21, 4  ;;  %vm638_vm9 = vcmp.lt.s32.totalorder %v1974_v21, 8  ;;  %vm643_vm10 = vcmp.ge.s32.totalorder %v1974_v21, 8 }
  0x4b   : > { %v488_v12 = vmul.f32 %v486_v11, %v1947_v6  ;;  %1471 = vmatmul.msk.f32.vlgmr.msra.gmra.mxu1 %vm355_vm1, %v345_v13  ;;  %1473 = vmatmul.msk.f32.vlgmr.msra.gmra.mxu2 %vm355_vm1, %v345_v13  ;;  %v585_v15 = vmul.f32 %v542_v55, %v542_v55  ;;  %vm681_vm11 = vcmp.lt.s32.totalorder %v1974_v21, 16  ;;  %vm686_vm12 = vcmp.ge.s32.totalorder %v1974_v21, 16 }
  0x4c   : > { %1475 = vmatmul.msk.f32.vlgmr.msra.gmra.mxu3 %vm355_vm1, %v345_v13  ;;  %1592 = vset.pattern.permute.xlu2 %v1780_v4  ;;  %vm724_vm13 = vcmp.lt.s32.totalorder %v1974_v21, 32  ;;  %vm729_vm14 = vcmp.ge.s32.totalorder %v1974_v21, 32  ;;  %vm767_vm15 = vcmp.lt.s32.totalorder %v1974_v21, 64  ;;  %vm2506_vm0 = vcmp.ge.s32.totalorder %v1974_v21, 64 }
  0x4d   : > { %496 = vperm.xlu1 %1591, %v488_v12  }
  0x50   : > { %471 = vperm.xlu0 %1590, %v1959_v14  }
  0x52   : > { %1470 = vmatmul.msk.f32.gmra.mxu0 %vm355_vm1, %v346_v17 }
  0x53   : > { %1472 = vmatmul.msk.f32.gmra.mxu1 %vm355_vm1, %v346_v17  ;;  %1474 = vmatmul.msk.f32.gmra.mxu2 %vm355_vm1, %v346_v17 }
  0x54   : > { %1476 = vmatmul.msk.f32.gmra.mxu3 %vm355_vm1, %v346_v17 }
  0x55   : > { %491 = vperm.xlu1 %1591, %v487_v16  }
  0xba   : > { %v1972_v18 = vpop.permute.xlu0 %476 }
  0xbf   : > { %v497_v19 = vpop.permute.xlu1 %496 }
  0xc2   : > { %v1976_v22 = vpop.permute.xlu0 %471 }
  0xc7   : > { %v1978_v23 = vpop.f32.mrf.mxu0  ;;  %v492_v27 = vpop.permute.xlu1 %491 }
  0xc8   : > { %v1980_v24 = vpop.f32.mrf.mxu1  ;;  %v479_v25 = vmul.f32 %v1976_v22, %v1978_v23 }
  0xc9   : > { %v480_v26 = vmul.f32 %v1976_v22, %v1980_v24 }
  0xca   : > { %v499_v28 = vadd.f32 %v492_v27, %v479_v25 }
  0xcb   : > { %515 = vrot.lane.b32.xlu1 %v480_v26, %s1781_s22 }
  0xcc   : > { %v507_v29 = vsel %vm483_vm2, %v499_v28, %v479_v25 }
  0xcd   : > { %511 = vrot.lane.b32.xlu0 %v507_v29, %s1781_s22 }
  0xcf   : > { %v1991_v30 = vpop.f32.mrf.mxu0 }
  0xd0   : > { %v481_v31 = vmul.f32 %v1972_v18, %v1991_v30  ;;  %v1998_v34 = vpop.f32.mrf.mxu1 }
  0xd1   : > { %v482_v35 = vmul.f32 %v1972_v18, %v1998_v34 }
  0xd2   : > { %v501_v32 = vadd.f32 %v497_v19, %v481_v31 }
  0xd4   : > { %v509_v33 = vsel %vm483_vm2, %v501_v32, %v481_v31 }
  0xd5   : > { %513 = vrot.lane.b32.xlu2 %v509_v33, %s1781_s22 }
  0xdd   : > { %517 = vrot.lane.b32.xlu2 %v482_v35, %s1781_s22 }
 0x12f   : > { %v514_v36 = vpop.permute.xlu2 %513 }
 0x137   : > { %v518_v37 = vpop.permute.xlu2 %517 }
 0x138   : > { %v521_v38 = vsel %vm519_vm3, %v514_v36, %v518_v37  ;;  %v523_v39 = vsel %vm519_vm3, %v518_v37, %v514_v36 }
 0x139   : > { %v532_v40 = vsel %vm524_vm4, %v523_v39, 0.0  ;;  %v537_v41 = vmul.f32 %v521_v38, %v1972_v18  ;;  %v629_v39 = vmul.f32 %v586_v9, %v586_v9 }
 0x13a   : > { %v536_v42 = vmul.f32 %v532_v40, %v1972_v18 }
 0x13b   : > { %v541_v43 = vadd.f32 %v537_v41, %v482_v35 }
 0x13c   : > { %v540_v44 = vadd.f32 %v536_v42, %v509_v33 }
 0x13d   : > { %550 = vrot.lane.b32.xlu0 %v541_v43, %s1782_s14  ;;  %v516_v45 = vpop.permute.xlu1 %515 }
 0x13e   : > { %546 = vrot.lane.b32.xlu2 %v540_v44, %s1782_s14 }
 0x13f   : > { %v512_v46 = vpop.permute.xlu0 %511 }
 0x140   : > { %v520_v47 = vsel %vm519_vm3, %v512_v46, %v516_v45  ;;  %v522_v48 = vsel %vm519_vm3, %v516_v45, %v512_v46 }
 0x141   : > { %v530_v49 = vsel %vm524_vm4, %v522_v48, 0.0  ;;  %v535_v50 = vmul.f32 %v520_v47, %v1976_v22 }
 0x142   : > { %v534_v52 = vmul.f32 %v530_v49, %v1976_v22 }
 0x143   : > { %v539_v53 = vadd.f32 %v535_v50, %v480_v26 }
 0x144   : > { %v538_v54 = vadd.f32 %v534_v52, %v507_v29 }
 0x145   : > { %574 = vperm.xlu0 %1590, %v543_v51  }
 0x146   : > { %544 = vrot.lane.b32.xlu1 %v538_v54, %s1782_s14  ;;  %548 = vrot.lane.b32.xlu2 %v539_v53, %s1782_s14 }
 0x14e   : > { %569 = vperm.xlu1 %1591, %v542_v55  }
 0x198   : > { %v547_v57 = vpop.permute.xlu2 %546 }
 0x1a0   : > { %v549_v3 = vpop.permute.xlu2 %548 }
 0x1af   : > { %v551_v56 = vpop.permute.xlu0 %550 }
 0x1b0   : > { %v556_v58 = vsel %vm552_vm5, %v551_v56, %v547_v57  ;;  %v554_v59 = vsel %vm552_vm5, %v547_v57, %v551_v56 }
 0x1b1   : > { %v565_v60 = vsel %vm557_vm6, %v556_v58, 0.0 }
 0x1b7   : > { %v2037_v61 = vpop.permute.xlu0 %574 }
 0x1b8   : > { %v579_v62 = vmul.f32 %v2037_v61, %v565_v60  ;;  %v580_v63 = vmul.f32 %v2037_v61, %v554_v59  ;;  %v545_v0 = vpop.permute.xlu1 %544 }
 0x1b9   : > { %v555_v4 = vsel %vm552_vm5, %v549_v3, %v545_v0  ;;  %v553_v5 = vsel %vm552_vm5, %v545_v0, %v549_v3 }
 0x1ba   : > { %v584_v1 = vadd.f32 %v580_v63, %v541_v43  ;;  %v583_v2 = vadd.f32 %v579_v62, %v540_v44  ;;  %v563_v7 = vsel %vm557_vm6, %v555_v4, 0.0  ;;  %v628_v44 = vmul.f32 %v585_v15, %v585_v15 }
 0x1bb   : > { %v672_v62 = vmul.f32 %v629_v39, %v629_v39 }
 0x1bc   : > { %593 = vrot.lane.b32.xlu0 %v584_v1, %s1783_s19  ;;  %589 = vrot.lane.b32.xlu2 %v583_v2, %s1783_s19  ;;  %v671_v3 = vmul.f32 %v628_v44, %v628_v44 }
 0x1c0   : > { %v2049_v8 = vpop.permute.xlu1 %569 }
 0x1c1   : > { %v577_v10 = vmul.f32 %v2049_v8, %v563_v7  ;;  %v578_v11 = vmul.f32 %v2049_v8, %v553_v5 }
 0x1c3   : > { %v581_v12 = vadd.f32 %v577_v10, %v538_v54  ;;  %v582_v13 = vadd.f32 %v578_v11, %v539_v53 }
 0x1c4   : > { %617 = vperm.xlu0 %1590, %v586_v9  }
 0x1c5   : > { %587 = vrot.lane.b32.xlu1 %v581_v12, %s1783_s19  ;;  %591 = vrot.lane.b32.xlu2 %v582_v13, %s1783_s19 }
 0x1cd   : > { %612 = vperm.xlu1 %1591, %v585_v15  }
 0x216   : > { %v590_v17 = vpop.permute.xlu2 %589 }
 0x21f   : > { %v592_v33 = vpop.permute.xlu2 %591 }
 0x22e   : > { %v594_v16 = vpop.permute.xlu0 %593 }
 0x22f   : > { %v599_v19 = vsel %vm595_vm7, %v594_v16, %v590_v17  ;;  %v597_v20 = vsel %vm595_vm7, %v590_v17, %v594_v16 }
 0x230   : > { %v608_v25 = vsel %vm600_vm8, %v599_v19, 0.0 }
 0x236   : > { %v2063_v26 = vpop.permute.xlu0 %617 }
 0x237   : > { %v622_v27 = vmul.f32 %v2063_v26, %v608_v25  ;;  %v623_v28 = vmul.f32 %v2063_v26, %v597_v20  ;;  %v588_v29 = vpop.permute.xlu1 %587 }
 0x238   : > { %v598_v35 = vsel %vm595_vm7, %v592_v33, %v588_v29  ;;  %v596_v36 = vsel %vm595_vm7, %v588_v29, %v592_v33  ;;  %v715_v29 = vmul.f32 %v672_v62, %v672_v62 }
 0x239   : > { %v626_v31 = vadd.f32 %v622_v27, %v583_v2  ;;  %v627_v32 = vadd.f32 %v623_v28, %v584_v1  ;;  %v606_v37 = vsel %vm600_vm8, %v598_v35, 0.0 }
 0x23b   : > { %632 = vrot.lane.b32.xlu2 %v626_v31, %s1784_s3  ;;  %636 = vrot.lane.b32.xlu0 %v627_v32, %s1784_s3 }
 0x23f   : > { %v2075_v38 = vpop.permute.xlu1 %612 }
 0x240   : > { %v620_v40 = vmul.f32 %v2075_v38, %v606_v37  ;;  %v621_v41 = vmul.f32 %v2075_v38, %v596_v36  ;;  %v758_v36 = vmul.f32 %v715_v29, %v715_v29  ;;  %v714_v37 = vmul.f32 %v671_v3, %v671_v3 }
 0x242   : > { %v624_v42 = vadd.f32 %v620_v40, %v581_v12  ;;  %v625_v43 = vadd.f32 %v621_v41, %v582_v13 }
 0x243   : > { %660 = vperm.xlu0 %1590, %v629_v39  }
 0x244   : > { %630 = vrot.lane.b32.xlu1 %v624_v42, %s1784_s3  ;;  %634 = vrot.lane.b32.xlu2 %v625_v43, %s1784_s3 }
 0x24c   : > { %655 = vperm.xlu1 %1591, %v628_v44  }
 0x295   : > { %v633_v46 = vpop.permute.xlu2 %632 }
 0x29e   : > { %v635_v56 = vpop.permute.xlu2 %634 }
 0x2ad   : > { %v637_v45 = vpop.permute.xlu0 %636 }
 0x2ae   : > { %v642_v47 = vsel %vm638_vm9, %v637_v45, %v633_v46  ;;  %v640_v48 = vsel %vm638_vm9, %v633_v46, %v637_v45 }
 0x2af   : > { %v651_v49 = vsel %vm643_vm10, %v642_v47, 0.0  ;;  %v757_v47 = vmul.f32 %v714_v37, %v714_v37 }
 0x2b5   : > { %v2089_v50 = vpop.permute.xlu0 %660 }
 0x2b6   : > { %v665_v51 = vmul.f32 %v2089_v50, %v651_v49  ;;  %v666_v52 = vmul.f32 %v2089_v50, %v640_v48  ;;  %v631_v53 = vpop.permute.xlu1 %630 }
 0x2b7   : > { %v641_v57 = vsel %vm638_vm9, %v635_v56, %v631_v53  ;;  %v639_v58 = vsel %vm638_vm9, %v631_v53, %v635_v56  ;;  %v800_v53 = vmul.f32 %v757_v47, %v757_v47 }
 0x2b8   : > { %v669_v54 = vadd.f32 %v665_v51, %v626_v31  ;;  %v670_v55 = vadd.f32 %v666_v52, %v627_v32  ;;  %v649_v59 = vsel %vm643_vm10, %v641_v57, 0.0 }
 0x2ba   : > { %675 = vrot.lane.b32.xlu2 %v669_v54, %s1785_s29  ;;  %679 = vrot.lane.b32.xlu0 %v670_v55, %s1785_s29 }
 0x2be   : > { %v2101_v60 = vpop.permute.xlu1 %655 }
 0x2bf   : > { %v663_v63 = vmul.f32 %v2101_v60, %v649_v59  ;;  %v664_v0 = vmul.f32 %v2101_v60, %v639_v58 }
 0x2c1   : > { %v667_v1 = vadd.f32 %v663_v63, %v624_v42  ;;  %v668_v2 = vadd.f32 %v664_v0, %v625_v43  ;;  %v801_v0 = vmul.f32 %v758_v36, %v758_v36 }
 0x2c2   : > { %703 = vperm.xlu0 %1590, %v672_v62  }
 0x2c3   : > { %673 = vrot.lane.b32.xlu1 %v667_v1, %s1785_s29  ;;  %677 = vrot.lane.b32.xlu2 %v668_v2, %s1785_s29 }
 0x2cb   : > { %698 = vperm.xlu1 %1591, %v671_v3  }
 0x314   : > { %v676_v5 = vpop.permute.xlu2 %675 }
 0x31d   : > { %v678_v19 = vpop.permute.xlu2 %677 }
 0x32c   : > { %v680_v4 = vpop.permute.xlu0 %679 }
 0x32d   : > { %v685_v7 = vsel %vm681_vm11, %v680_v4, %v676_v5  ;;  %v683_v9 = vsel %vm681_vm11, %v676_v5, %v680_v4 }
 0x32e   : > { %v694_v10 = vsel %vm686_vm12, %v685_v7, 0.0 }
 0x334   : > { %v2115_v11 = vpop.permute.xlu0 %703 }
 0x335   : > { %v708_v12 = vmul.f32 %v2115_v11, %v694_v10  ;;  %v709_v13 = vmul.f32 %v2115_v11, %v683_v9  ;;  %v674_v15 = vpop.permute.xlu1 %673 }
 0x336   : > { %v684_v20 = vsel %vm681_vm11, %v678_v19, %v674_v15  ;;  %v682_v25 = vsel %vm681_vm11, %v674_v15, %v678_v19 }
 0x337   : > { %v712_v16 = vadd.f32 %v708_v12, %v669_v54  ;;  %v713_v17 = vadd.f32 %v709_v13, %v670_v55  ;;  %v692_v27 = vsel %vm686_vm12, %v684_v20, 0.0 }
 0x339   : > { %718 = vrot.lane.b32.xlu2 %v712_v16, %s2507_s30  ;;  %722 = vrot.lane.b32.xlu0 %v713_v17, %s2507_s30 }
 0x33d   : > { %v2127_v28 = vpop.permute.xlu1 %698 }
 0x33e   : > { %v706_v31 = vmul.f32 %v2127_v28, %v692_v27  ;;  %v707_v32 = vmul.f32 %v2127_v28, %v682_v25 }
 0x340   : > { %v710_v33 = vadd.f32 %v706_v31, %v667_v1  ;;  %v711_v35 = vadd.f32 %v707_v32, %v668_v2 }
 0x341   : > { %746 = vperm.xlu0 %1590, %v715_v29  }
 0x342   : > { %716 = vrot.lane.b32.xlu1 %v710_v33, %s2507_s30  ;;  %720 = vrot.lane.b32.xlu2 %v711_v35, %s2507_s30 }
 0x349   : > { %789 = vperm.xlu0 %1590, %v758_v36  }
 0x34a   : > { %741 = vperm.xlu1 %1591, %v714_v37  }
 0x393   : > { %v719_v40 = vpop.permute.xlu2 %718 }
 0x39c   : > { %v721_v46 = vpop.permute.xlu2 %720 }
 0x3ab   : > { %v723_v39 = vpop.permute.xlu0 %722 }
 0x3ac   : > { %v726_v41 = vsel %vm724_vm13, %v719_v40, %v723_v39  ;;  %v728_v56 = vsel %vm724_vm13, %v723_v39, %v719_v40 }
 0x3ad   : > { %v737_v59 = vsel %vm729_vm14, %v728_v56, 0.0 }
 0x3b3   : > { %v2136_v42 = vpop.permute.xlu0 %746 }
 0x3b4   : > { %v752_v43 = vmul.f32 %v2136_v42, %v726_v41  ;;  %v717_v44 = vpop.permute.xlu1 %716  ;;  %v751_v62 = vmul.f32 %v2136_v42, %v737_v59  ;;  %v2226_v59 = vpop.f32.mrf.mxu2 }
 0x3b5   : > { %v727_v48 = vsel %vm724_vm13, %v721_v46, %v717_v44  ;;  %v725_v49 = vsel %vm724_vm13, %v717_v44, %v721_v46  ;;  %v2199_v44 = vld [vmem:[%s2500_s2] sm:$0xff] }
 0x3b6   : > { %v756_v45 = vadd.f32 %v752_v43, %v713_v17  ;;  %v735_v51 = vsel %vm729_vm14, %v727_v48, 0.0  ;;  %v755_v63 = vadd.f32 %v751_v62, %v712_v16 }
 0x3b8   : > { %765 = vrot.lane.b32.xlu0 %v756_v45, %s1787_s13 }
 0x3bb   : > { %v2159_v2 = vpop.permute.xlu0 %789 }
 0x3bc   : > { %v2147_v52 = vpop.permute.xlu1 %741 }
 0x3bd   : > { %v749_v54 = vmul.f32 %v2147_v52, %v735_v51  ;;  %v750_v55 = vmul.f32 %v2147_v52, %v725_v49 }
 0x3bf   : > { %v753_v57 = vadd.f32 %v749_v54, %v710_v33  ;;  %v754_v58 = vadd.f32 %v750_v55, %v711_v35  ;;  %v2218_v54 = vpop.f32.mrf.mxu3 }
 0x3c0   : > { %814 = vperm.xlu0 %1590, %v800_v53  }
 0x3c1   : > { %759 = vrot.lane.b32.xlu1 %v753_v57, %s1787_s13  ;;  %763 = vrot.lane.b32.xlu2 %v754_v58, %s1787_s13 }
 0x3c9   : > { %784 = vperm.xlu1 %1591, %v757_v47   ;;  %761 = vrot.lane.b32.xlu2 %v755_v63, %s1787_s13  ;;  %v2209_v47 = vld [vmem:[%s2500_s2 + $0x8] sm:$0xff] }
 0x3d1   : > { %819 = vperm.xlu2 %1592, %v801_v0  }
 0x41b   : > { %v764_v1 = vpop.permute.xlu2 %763 }
 0x423   : > { %v762_v3 = vpop.permute.xlu2 %761 }
 0x42a   : > { %v766_v4 = vpop.permute.xlu0 %765 }
 0x42b   : > { %v769_v5 = vsel %vm767_vm15, %v762_v3, %v766_v4  ;;  %v771_v7 = vsel %vm767_vm15, %v766_v4, %v762_v3  ;;  %v2167_v9 = vpop.permute.xlu2 %819 }
 0x42c   : > { %v780_v10 = vsel %vm2506_vm0, %v771_v7, 0.0  ;;  %v795_v13 = vmul.f32 %v2159_v2, %v769_v5  ;;  %v2174_v15 = vmul.f32 0.0, %v2167_v9  ;;  %v977_v7 = vmul.f32 %v1976_v22, %v2218_v54 }
 0x42d   : > { %v794_v12 = vmul.f32 %v2159_v2, %v780_v10 }
 0x42e   : > { %v799_v17 = vadd.f32 %v795_v13, %v756_v45 }
 0x42f   : > { %v798_v16 = vadd.f32 %v794_v12, %v755_v63 }
 0x431   : > { %v825_v19 = vmul.f32 %v2167_v9, %v798_v16  ;;  %v828_v20 = vadd.f32 %v2174_v15, %v798_v16 }
 0x432   : > { %v2181_v31 = vpop.permute.xlu0 %814 }
 0x433   : > { %v760_v25 = vpop.permute.xlu1 %759  ;;  %861 = vmatpush.msrb.mxu0 %v828_v20  ;;  %v829_v27 = vadd.f32 %v825_v19, %v799_v17  ;;  %v2192_v40 = vmul.f32 0.0, %v2181_v31 }
 0x434   : > { %v770_v29 = vsel %vm767_vm15, %v764_v1, %v760_v25  ;;  %v768_v32 = vsel %vm767_vm15, %v760_v25, %v764_v1 }
 0x435   : > { %834 = vrot.lane.b32.xlu1 %v829_v27, %s1781_s22  ;;  %884 = vmatpush.msrb.mxu1 %v829_v27  ;;  %v778_v33 = vsel %vm2506_vm0, %v770_v29, 0.0  ;;  %vm838_vm0 = vcmask 7168  }
 0x43b   : > { %v2187_v35 = vpop.permute.xlu1 %784 }
 0x43c   : > { %v793_v36 = vmul.f32 %v2187_v35, %v768_v32  ;;  %v792_v37 = vmul.f32 %v2187_v35, %v778_v33 }
 0x43e   : > { %v796_v39 = vadd.f32 %v792_v37, %v753_v57  ;;  %v797_v45 = vadd.f32 %v793_v36, %v754_v58  ;;  %v2221_v57 = vpop.f32.mrf.mxu3 }
 0x43f   : > { %v979_v58 = vmul.f32 %v1972_v18, %v2221_v57 }
 0x440   : > { %v823_v41 = vmul.f32 %v2181_v31, %v796_v39  ;;  %v826_v43 = vadd.f32 %v2192_v40, %v796_v39 }
 0x442   : > { %862 = vmatpush.msrb.mxu0 %v826_v43  ;;  %v827_v46 = vadd.f32 %v823_v41, %v797_v45 }
 0x443   : > { %1477 = vmatmul.msk.f32.vlgmr.msrb.gmra.mxu0 %vm355_vm1, %v2199_v44 }
 0x444   : > { %832 = vrot.lane.b32.xlu2 %v827_v46, %s1781_s22  ;;  %885 = vmatpush.msrb.mxu1 %v827_v46 }
 0x445   : > { %1479 = vmatmul.msk.f32.vlgmr.msrb.gmra.mxu1 %vm355_vm1, %v2199_v44 }
 0x44b   : > { %1478 = vmatmul.msk.f32.gmra.mxu0 %vm355_vm1, %v2209_v47 }
 0x44d   : > { %1480 = vmatmul.msk.f32.gmra.mxu1 %vm355_vm1, %v2209_v47 }
 0x49e   : > { %v833_v48 = vpop.permute.xlu2 %832 }
 0x49f   : > { %839 = vst.msk [vmem:[#allocation3] sm:$0xff] %vm838_vm0, %v833_v48 }
 0x4a6   : > { %v980_v49 = vld [vmem:[#allocation3] sm:$0xff] }
 0x4a7   : > { %v835_v51 = vpop.permute.xlu1 %834  ;;  %v982_v53 = vmul.f32 %v980_v49, %v1959_v14  ;;  %v976_v14 = vmul.f32 %v1976_v22, %v2226_v59 }
 0x4a8   : > { %840 = vst.msk [vmem:[#allocation3 + $0x8] sm:$0xff] %vm838_vm0, %v835_v51 }
 0x4a9   : > { %986 = vperm.xlu1 %1591, %v982_v53  }
 0x4af   : > { %v981_v55 = vld [vmem:[#allocation3 + $0x8] sm:$0xff] }
 0x4b0   : > { %v983_v56 = vmul.f32 %v981_v55, %v1947_v6  ;;  %v2233_v6 = vpop.f32.mrf.mxu2 }
 0x4b1   : > { %v978_v1 = vmul.f32 %v1972_v18, %v2233_v6 }
 0x4b2   : > { %991 = vperm.xlu0 %1590, %v983_v56  }
 0x4ba   : > { %1008 = vrot.lane.b32.xlu0 %v979_v58, %s1781_s22 }
 0x51b   : > { %v987_v62 = vpop.permute.xlu1 %986 }
 0x51c   : > { %v994_v63 = vadd.f32 %v987_v62, %v976_v14 }
 0x51e   : > { %v998_v0 = vsel %vm483_vm2, %v994_v63, %v976_v14 }
 0x51f   : > { %1002 = vrot.lane.b32.xlu1 %v998_v0, %s1781_s22 }
 0x524   : > { %v992_v3 = vpop.permute.xlu0 %991 }
 0x525   : > { %v996_v4 = vadd.f32 %v992_v3, %v978_v1 }
 0x527   : > { %v1000_v5 = vsel %vm483_vm2, %v996_v4, %v978_v1  ;;  %vm2520_vm2 = vcmp.ge.s32.totalorder %v1974_v21, 64 }
 0x528   : > { %1004 = vrot.lane.b32.xlu2 %v1000_v5, %s1781_s22 }
 0x52c   : > { %v1009_v10 = vpop.permute.xlu0 %1008 }
 0x530   : > { %1006 = vrot.lane.b32.xlu2 %v977_v7, %s1781_s22 }
 0x582   : > { %v1005_v12 = vpop.permute.xlu2 %1004 }
 0x583   : > { %v1011_v13 = vsel %vm519_vm3, %v1005_v12, %v1009_v10  ;;  %v1013_v16 = vsel %vm519_vm3, %v1009_v10, %v1005_v12 }
 0x584   : > { %v1016_v17 = vsel %vm524_vm4, %v1013_v16, 0.0  ;;  %v1021_v19 = vmul.f32 %v1011_v13, %v1972_v18 }
 0x585   : > { %v1020_v20 = vmul.f32 %v1016_v17, %v1972_v18 }
 0x586   : > { %v1025_v25 = vadd.f32 %v1021_v19, %v979_v58 }
 0x587   : > { %v1024_v27 = vadd.f32 %v1020_v20, %v1000_v5 }
 0x588   : > { %1032 = vrot.lane.b32.xlu1 %v1025_v25, %s1782_s14 }
 0x589   : > { %1028 = vrot.lane.b32.xlu0 %v1024_v27, %s1782_s14 }
 0x58a   : > { %v1007_v29 = vpop.permute.xlu2 %1006 }
 0x591   : > { %v1003_v32 = vpop.permute.xlu1 %1002 }
 0x592   : > { %v1010_v33 = vsel %vm519_vm3, %v1003_v32, %v1007_v29  ;;  %v1012_v36 = vsel %vm519_vm3, %v1007_v29, %v1003_v32  ;;  %vm2521_vm3 = vmmov %vm2520_vm2 }
 0x593   : > { %v1014_v37 = vsel %vm524_vm4, %v1012_v36, 0.0  ;;  %v1019_v39 = vmul.f32 %v1010_v33, %v1976_v22 }
 0x594   : > { %v1018_v18 = vmul.f32 %v1014_v37, %v1976_v22 }
 0x595   : > { %v1023_v41 = vadd.f32 %v1019_v39, %v977_v7 }
 0x596   : > { %v1022_v43 = vadd.f32 %v1018_v18, %v998_v0 }
 0x597   : > { %1030 = vrot.lane.b32.xlu0 %v1023_v41, %s1782_s14 }
 0x598   : > { %1026 = vrot.lane.b32.xlu2 %v1022_v43, %s1782_s14 }
 0x5f2   : > { %v1027_v58 = vpop.permute.xlu2 %1026 }
 0x5fa   : > { %v1033_v45 = vpop.permute.xlu1 %1032 }
 0x5fb   : > { %v1029_v46 = vpop.permute.xlu0 %1028 }
 0x5fc   : > { %v1035_v48 = vsel %vm552_vm5, %v1029_v46, %v1033_v45  ;;  %v1037_v49 = vsel %vm552_vm5, %v1033_v45, %v1029_v46 }
 0x5fd   : > { %v1040_v51 = vsel %vm557_vm6, %v1037_v49, 0.0  ;;  %v1045_v53 = vmul.f32 %v1035_v48, %v2037_v61 }
 0x5fe   : > { %v1044_v22 = vmul.f32 %v1040_v51, %v2037_v61 }
 0x5ff   : > { %v1049_v55 = vadd.f32 %v1045_v53, %v1025_v25 }
 0x600   : > { %v1048_v56 = vadd.f32 %v1044_v22, %v1024_v27 }
 0x601   : > { %1056 = vrot.lane.b32.xlu2 %v1049_v55, %s1783_s19 }
 0x602   : > { %1052 = vrot.lane.b32.xlu1 %v1048_v56, %s1783_s19 }
 0x609   : > { %v1031_v14 = vpop.permute.xlu0 %1030 }
 0x60a   : > { %v1034_v62 = vsel %vm552_vm5, %v1027_v58, %v1031_v14  ;;  %v1036_v63 = vsel %vm552_vm5, %v1031_v14, %v1027_v58 }
 0x60b   : > { %v1038_v0 = vsel %vm557_vm6, %v1036_v63, 0.0  ;;  %v1043_v1 = vmul.f32 %v1034_v62, %v2049_v8 }
 0x60c   : > { %v1042_v61 = vmul.f32 %v1038_v0, %v2049_v8 }
 0x60d   : > { %v1047_v3 = vadd.f32 %v1043_v1, %v1023_v41 }
 0x60e   : > { %v1046_v4 = vadd.f32 %v1042_v61, %v1022_v43 }
 0x60f   : > { %1054 = vrot.lane.b32.xlu1 %v1047_v3, %s1783_s19 }
 0x610   : > { %1050 = vrot.lane.b32.xlu0 %v1046_v4, %s1783_s19  ;;  %s1689_s19 = scalar_lea.hbm %s2505_s7, 128 }
 0x65b   : > { %v1057_v5 = vpop.permute.xlu2 %1056 }
 0x674   : > { %v1053_v7 = vpop.permute.xlu1 %1052 }
 0x675   : > { %v1059_v10 = vsel %vm595_vm7, %v1053_v7, %v1057_v5  ;;  %v1061_v12 = vsel %vm595_vm7, %v1057_v5, %v1053_v7 }
 0x676   : > { %v1064_v13 = vsel %vm600_vm8, %v1061_v12, 0.0  ;;  %v1069_v16 = vmul.f32 %v1059_v10, %v2063_v26 }
 0x677   : > { %v1068_v8 = vmul.f32 %v1064_v13, %v2063_v26 }
 0x678   : > { %v1073_v17 = vadd.f32 %v1069_v16, %v1049_v55 }
 0x679   : > { %v1072_v19 = vadd.f32 %v1068_v8, %v1048_v56 }
 0x67a   : > { %1080 = vrot.lane.b32.xlu0 %v1073_v17, %s1784_s3 }
 0x67b   : > { %1076 = vrot.lane.b32.xlu2 %v1072_v19, %s1784_s3 }
 0x681   : > { %v1055_v20 = vpop.permute.xlu1 %1054 }
 0x682   : > { %v1051_v25 = vpop.permute.xlu0 %1050 }
 0x683   : > { %v1058_v27 = vsel %vm595_vm7, %v1051_v25, %v1055_v20  ;;  %v1060_v29 = vsel %vm595_vm7, %v1055_v20, %v1051_v25 }
 0x684   : > { %v1062_v32 = vsel %vm600_vm8, %v1060_v29, 0.0  ;;  %v1067_v33 = vmul.f32 %v1058_v27, %v2075_v38 }
 0x685   : > { %v1066_v26 = vmul.f32 %v1062_v32, %v2075_v38 }
 0x686   : > { %v1071_v36 = vadd.f32 %v1067_v33, %v1047_v3 }
 0x687   : > { %v1070_v37 = vadd.f32 %v1066_v26, %v1046_v4 }
 0x688   : > { %1078 = vrot.lane.b32.xlu2 %v1071_v36, %s1784_s3 }
 0x689   : > { %1074 = vrot.lane.b32.xlu1 %v1070_v37, %s1784_s3 }
 0x6d5   : > { %v1077_v39 = vpop.permute.xlu2 %1076 }
 0x6e2   : > { %v1079_v51 = vpop.permute.xlu2 %1078 }
 0x6ec   : > { %v1081_v18 = vpop.permute.xlu0 %1080 }
 0x6ed   : > { %v1083_v41 = vsel %vm638_vm9, %v1077_v39, %v1081_v18  ;;  %v1085_v43 = vsel %vm638_vm9, %v1081_v18, %v1077_v39  ;;  %v340_v39 = vld [vmem:[%s2503_s5 + $0x8] sm:$0xff] }
 0x6ee   : > { %v1088_v45 = vsel %vm643_vm10, %v1085_v43, 0.0  ;;  %v1093_v46 = vmul.f32 %v1083_v41, %v2089_v50 }
 0x6ef   : > { %v1092_v38 = vmul.f32 %v1088_v45, %v2089_v50 }
 0x6f0   : > { %v1097_v48 = vadd.f32 %v1093_v46, %v1073_v17 }
 0x6f1   : > { %v1096_v49 = vadd.f32 %v1092_v38, %v1072_v19 }
 0x6f2   : > { %1104 = vrot.lane.b32.xlu1 %v1097_v48, %s1785_s29 }
 0x6f3   : > { %1100 = vrot.lane.b32.xlu0 %v1096_v49, %s1785_s29 }
 0x6fb   : > { %v1075_v53 = vpop.permute.xlu1 %1074 }
 0x6fc   : > { %v1082_v22 = vsel %vm638_vm9, %v1075_v53, %v1079_v51  ;;  %v1084_v55 = vsel %vm638_vm9, %v1079_v51, %v1075_v53  ;;  %v339_v51 = vld [vmem:[%s2503_s5] sm:$0xff]  ;;  %v864_v53 = vpop.f32.mrf.mxu0 }
 0x6fd   : > { %v1086_v56 = vsel %vm643_vm10, %v1084_v55, 0.0  ;;  %v1091_v58 = vmul.f32 %v1082_v22, %v2101_v60  ;;  %v887_v22 = vpop.f32.mrf.mxu1 }
 0x6fe   : > { %v1090_v50 = vmul.f32 %v1086_v56, %v2101_v60 }
 0x6ff   : > { %v1095_v14 = vadd.f32 %v1091_v58, %v1071_v36 }
 0x700   : > { %v1094_v62 = vadd.f32 %v1090_v50, %v1070_v37 }
 0x701   : > { %1102 = vrot.lane.b32.xlu0 %v1095_v14, %s1785_s29 }
 0x702   : > { %1098 = vrot.lane.b32.xlu2 %v1094_v62, %s1785_s29 }
 0x75c   : > { %v1099_v10 = vpop.permute.xlu2 %1098 }
 0x764   : > { %v1105_v63 = vpop.permute.xlu1 %1104 }
 0x765   : > { %v1101_v0 = vpop.permute.xlu0 %1100 }
 0x766   : > { %v1107_v1 = vsel %vm681_vm11, %v1101_v0, %v1105_v63  ;;  %v1109_v61 = vsel %vm681_vm11, %v1105_v63, %v1101_v0  ;;  %v890_v0 = vpop.f32.mrf.mxu1 }
 0x767   : > { %v1112_v3 = vsel %vm686_vm12, %v1109_v61, 0.0  ;;  %v1117_v4 = vmul.f32 %v1107_v1, %v2115_v11 }
 0x768   : > { %v1116_v60 = vmul.f32 %v1112_v3, %v2115_v11  ;;  %v891_v3 = vadd.f32 %v890_v0, %v1998_v34 }
 0x769   : > { %v1121_v5 = vadd.f32 %v1117_v4, %v1097_v48 }
 0x76a   : > { %v1120_v7 = vadd.f32 %v1116_v60, %v1096_v49 }
 0x76b   : > { %1128 = vrot.lane.b32.xlu2 %v1121_v5, %s2507_s30 }
 0x76c   : > { %1124 = vrot.lane.b32.xlu1 %v1120_v7, %s2507_s30 }
 0x773   : > { %v1103_v12 = vpop.permute.xlu0 %1102 }
 0x774   : > { %v1106_v13 = vsel %vm681_vm11, %v1099_v10, %v1103_v12  ;;  %v1108_v16 = vsel %vm681_vm11, %v1103_v12, %v1099_v10 }
 0x775   : > { %v1110_v8 = vsel %vm686_vm12, %v1108_v16, 0.0  ;;  %v1115_v17 = vmul.f32 %v1106_v13, %v2127_v28 }
 0x776   : > { %v1114_v11 = vmul.f32 %v1110_v8, %v2127_v28 }
 0x777   : > { %v1119_v19 = vadd.f32 %v1115_v17, %v1095_v14  ;;  %v867_v14 = vpop.f32.mrf.mxu0 }
 0x778   : > { %v1118_v20 = vadd.f32 %v1114_v11, %v1094_v62  ;;  %v868_v61 = vadd.f32 %v867_v14, %v1991_v30 }
 0x779   : > { %1126 = vrot.lane.b32.xlu1 %v1119_v19, %s2507_s30 }
 0x77a   : > { %1122 = vrot.lane.b32.xlu0 %v1118_v20, %s2507_s30 }
 0x7c5   : > { %v1129_v25 = vpop.permute.xlu2 %1128 }
 0x7de   : > { %v1125_v27 = vpop.permute.xlu1 %1124 }
 0x7df   : > { %v1131_v29 = vsel %vm724_vm13, %v1125_v27, %v1129_v25  ;;  %v1133_v32 = vsel %vm724_vm13, %v1129_v25, %v1125_v27  ;;  %v888_v25 = vadd.f32 %v887_v22, %v1980_v24 }
 0x7e0   : > { %v1136_v33 = vsel %vm729_vm14, %v1133_v32, 0.0  ;;  %v1141_v26 = vmul.f32 %v1131_v29, %v2136_v42 }
 0x7e1   : > { %v1140_v28 = vmul.f32 %v1136_v33, %v2136_v42 }
 0x7e2   : > { %v1145_v36 = vadd.f32 %v1141_v26, %v1121_v5 }
 0x7e3   : > { %v1144_v37 = vadd.f32 %v1140_v28, %v1120_v7  ;;  %v343_v28 = vld [vmem:[#allocation7] sm:$0xff] }
 0x7e4   : > { %1152 = vrot.lane.b32.xlu0 %v1145_v36, %s1787_s13 }
 0x7e5   : > { %1148 = vrot.lane.b32.xlu2 %v1144_v37, %s1787_s13 }
 0x7eb   : > { %v1127_v18 = vpop.permute.xlu1 %1126 }
 0x7ec   : > { %900 = vperm.xlu0 %1590, %v340_v39   ;;  %v1123_v41 = vpop.permute.xlu0 %1122 }
 0x7ed   : > { %v1130_v43 = vsel %vm724_vm13, %v1123_v41, %v1127_v18  ;;  %v1132_v45 = vsel %vm724_vm13, %v1127_v18, %v1123_v41 }
 0x7ee   : > { %v1134_v42 = vsel %vm729_vm14, %v1132_v45, 0.0  ;;  %v1139_v46 = vmul.f32 %v1130_v43, %v2147_v52 }
 0x7ef   : > { %v1138_v38 = vmul.f32 %v1134_v42, %v2147_v52 }
 0x7f0   : > { %v1143_v48 = vadd.f32 %v1139_v46, %v1119_v19 }
 0x7f1   : > { %v1142_v49 = vadd.f32 %v1138_v38, %v1118_v20  ;;  %v865_v20 = vadd.f32 %v864_v53, %v1978_v23 }
 0x7f2   : > { %1150 = vrot.lane.b32.xlu2 %v1143_v48, %s1787_s13 }
 0x7f3   : > { %1146 = vrot.lane.b32.xlu1 %v1142_v49, %s1787_s13 }
 0x7fb   : > { %895 = vperm.xlu1 %1591, %v339_v51  }
 0x83f   : > { %v1149_v55 = vpop.permute.xlu2 %1148 }
 0x84c   : > { %v1151_v30 = vpop.permute.xlu2 %1150 }
 0x856   : > { %v1153_v56 = vpop.permute.xlu0 %1152 }
 0x857   : > { %v1155_v58 = vsel %vm767_vm15, %v1149_v55, %v1153_v56  ;;  %v1157_v52 = vsel %vm767_vm15, %v1153_v56, %v1149_v55 }
 0x858   : > { %v1160_v50 = vsel %vm2520_vm2, %v1157_v52, 0.0  ;;  %v1165_v63 = vmul.f32 %v1155_v58, %v2159_v2 }
 0x859   : > { %v1164_v62 = vmul.f32 %v1160_v50, %v2159_v2 }
 0x85a   : > { %v1169_v4 = vadd.f32 %v1165_v63, %v1145_v36 }
 0x85b   : > { %v1168_v1 = vadd.f32 %v1164_v62, %v1144_v37 }
 0x85d   : > { %v1180_v60 = vadd.f32 %v1168_v1, %v2174_v15  ;;  %v1177_v5 = vmul.f32 %v1168_v1, %v2167_v9 }
 0x85e   : > { %v2381_v7 = vpop.permute.xlu0 %900 }
 0x85f   : > { %v905_v10 = vmul.f32 %v2381_v7, %v868_v61  ;;  %v906_v12 = vmul.f32 %v2381_v7, %v891_v3  ;;  %1206 = vmatpush.msra.mxu0 %v1180_v60  ;;  %v1181_v2 = vadd.f32 %v1177_v5, %v1169_v4 }
 0x861   : > { %1593 = vtanh.f32 %v905_v10  ;;  %1186 = vrot.lane.b32.xlu0 %v1181_v2, %s1781_s22  ;;  %1229 = vmatpush.msra.mxu1 %v1181_v2 }
 0x862   : > { %1595 = vtanh.f32 %v906_v12 }
 0x865   : > { %v1147_v34 = vpop.permute.xlu1 %1146 }
 0x866   : > { %v1154_v9 = vsel %vm767_vm15, %v1147_v34, %v1151_v30  ;;  %v1156_v15 = vsel %vm767_vm15, %v1151_v30, %v1147_v34 }
 0x867   : > { %v1594_v13 = vpop.eup %1593  ;;  %v1158_v16 = vsel %vm2521_vm3, %v1156_v15, 0.0  ;;  %v1163_v11 = vmul.f32 %v1154_v9, %v2187_v35 }
 0x868   : > { %v1596_v8 = vpop.eup %1595  ;;  %965 = vst [vmem:[%s1940_s20 + $0x20] sm:$0xff] %v1594_v13  ;;  %v1162_v17 = vmul.f32 %v1158_v16, %v2187_v35  ;;  %931 = vmatpush.msrb.mxu2 %v1594_v13 }
 0x869   : > { %966 = vst [vmem:[%s1940_s20 + $0x28] sm:$0xff] %v1596_v8  ;;  %954 = vmatpush.msrb.mxu3 %v1596_v8  ;;  %v1167_v27 = vadd.f32 %v1163_v11, %v1143_v48 }
 0x86a   : > { %v1166_v19 = vadd.f32 %v1162_v17, %v1142_v49 }
 0x86c   : > { %v1178_v29 = vadd.f32 %v1166_v19, %v2192_v40  ;;  %v1175_v21 = vmul.f32 %v1166_v19, %v2181_v31 }
 0x86d   : > { %v896_v32 = vpop.permute.xlu1 %895 }
 0x86e   : > { %v903_v33 = vmul.f32 %v896_v32, %v865_v20  ;;  %v904_v26 = vmul.f32 %v896_v32, %v888_v25  ;;  %1207 = vmatpush.msra.mxu0 %v1178_v29  ;;  %v1179_v35 = vadd.f32 %v1175_v21, %v1167_v27 }
 0x86f   : > { %1485 = vmatmul.msk.f32.vlgmr.msra.gmra.mxu0 %vm355_vm1, %v2199_v44 }
 0x870   : > { %1597 = vtanh.f32 %v903_v33  ;;  %1184 = vrot.lane.b32.xlu2 %v1179_v35, %s1781_s22  ;;  %1230 = vmatpush.msra.mxu1 %v1179_v35  ;;  %s1510_s22 = sshll.u32 %s1851_s28, 5 }
 0x871   : > { %1599 = vtanh.f32 %v904_v26  ;;  %1487 = vmatmul.msk.f32.vlgmr.msra.gmra.mxu1 %vm355_vm1, %v2199_v44  ;;  %v344_v44 = vld [vmem:[#allocation7 + $0x8] sm:$0xff]  ;;  %s1336_s13 = scalar_lea.hbm %s2505_s7, %s1510_s22 }
 0x872   : > { %s1339_s17 = sshll.u32 %s1336_s13, 4  ;;  %s1340_s17 = int_to_ptr.hbm [resolvable:$true] %s1339_s17 }
 0x873   : > { %s1683_s9 = sshra.s32 %s1340_s17, 4  ;;  %s1684_s9 = int_to_ptr.hbm [resolvable:$true] %s1683_s9 }
 0x874   : > { %s1685_s10 = scalar_lea.hbm %s1684_s9, 64  ;;  %p1690_p12 = scmp.lt.s32.totalorder %s1684_s9, %s2505_s7 }
 0x875   : > { %p1686_p1 = scmp.ne.s32.totalorder %s1684_s9, %s1685_s10  ;;  %p1691_p11 = scmp.lt.s32.totalorder %s1689_s19, %s1685_s10 }
 0x876   : > { %v1598_v23 = vpop.eup %1597 }
 0x877   : > { %v1600_v24 = vpop.eup %1599  ;;  %963 = vst [vmem:[%s1940_s20] sm:$0xff] %v1598_v23  ;;  %932 = vmatpush.msrb.mxu2 %v1598_v23  ;;  %1486 = vmatmul.msk.f32.gmra.mxu0 %vm355_vm1, %v2209_v47  ;;  %p1687_p4 = pnand %p1686_p1, %p1898_p10  ;;  %p1692_p2 = por %p1691_p11, %p1690_p12 }
 0x878   : > { %964 = vst [vmem:[%s1940_s20 + $0x8] sm:$0xff] %v1600_v24  ;;  %955 = vmatpush.msrb.mxu3 %v1600_v24  ;;  %1481 = vmatmul.msk.f32.vlgmr.msrb.gmra.mxu2 %vm355_vm1, %v343_v28 }
 0x879   : > { %1488 = vmatmul.msk.f32.gmra.mxu1 %vm355_vm1, %v2209_v47  ;;  %1483 = vmatmul.msk.f32.vlgmr.msrb.gmra.mxu3 %vm355_vm1, %v343_v28  ;;  %p1688_p9 = pneg %p1687_p4 }
 0x87b   : > { %p1693_p13 = pnand %p1692_p2, %p1688_p9 }
 0x880   : > { %1482 = vmatmul.msk.f32.gmra.mxu2 %vm355_vm1, %v344_v44 }
 0x881   : > { %1484 = vmatmul.msk.f32.gmra.mxu3 %vm355_vm1, %v344_v44 }
 0x8ca   : > { %v1185_v31 = vpop.permute.xlu2 %1184 }
 0x8cb   : > { %1190 = vst.msk [vmem:[#allocation3] sm:$0xff] %vm838_vm0, %v1185_v31 }
 0x8d3   : > { %v1187_v40 = vpop.permute.xlu0 %1186 }
 0x8d4   : > { %1191 = vst.msk [vmem:[#allocation3 + $0x8] sm:$0xff] %vm838_vm0, %v1187_v40 }
 0x8ec   : > { %v1209_v36 = vpop.f32.mrf.mxu0 }
 0x8ed   : > { %v1210_v47 = vadd.f32 %v1209_v36, %v2226_v59 }
 0x8ee   : > { %v1232_v37 = vpop.f32.mrf.mxu1 }
 0x8ef   : > { %v1238_v39 = vmul.f32 %v1210_v47, %v896_v32  ;;  %v1233_v18 = vadd.f32 %v1232_v37, %v2218_v54 }
 0x8f1   : > { %1601 = vtanh.f32 %v1238_v39  ;;  %v1239_v41 = vmul.f32 %v1233_v18, %v896_v32 }
 0x8f3   : > { %1603 = vtanh.f32 %v1239_v41 }
 0x8f4   : > { %v1212_v43 = vpop.f32.mrf.mxu0 }
 0x8f5   : > { %v1213_v45 = vadd.f32 %v1212_v43, %v2233_v6 }
 0x8f6   : > { %v1235_v42 = vpop.f32.mrf.mxu1 }
 0x8f7   : > { %v1602_v46 = vpop.eup %1601  ;;  %v1240_v38 = vmul.f32 %v1213_v45, %v2381_v7  ;;  %v1236_v48 = vadd.f32 %v1235_v42, %v2221_v57 }
 0x8f8   : > { %1493 = vst [vmem:[%s1940_s20 + $0x10] sm:$0xff] %v1602_v46 }
 0x8f9   : > { %v1604_v59 = vpop.eup %1603  ;;  %1605 = vtanh.f32 %v1240_v38  ;;  %v1241_v54 = vmul.f32 %v1236_v48, %v2381_v7 }
 0x8fa   : > { %1494 = vst [vmem:[%s1940_s20 + $0x18] sm:$0xff] %v1604_v59 }
 0x8fb   : > { %1607 = vtanh.f32 %v1241_v54 }
 0x8ff   : > { %v1606_v49 = vpop.eup %1605 }
 0x900   : > { %1495 = vst [vmem:[%s1940_s20 + $0x30] sm:$0xff] %v1606_v49  ;;  %1260 = vmatpush.msra.mxu2 %v1606_v49 }
 0x901   : > { %v1608_v6 = vpop.eup %1607 }
 0x902   : > { %1496 = vst [vmem:[%s1940_s20 + $0x38] sm:$0xff] %v1608_v6  ;;  %1261 = vmatpush.msra.mxu2 %v1602_v46  ;;  %1283 = vmatpush.msra.mxu3 %v1608_v6 }
 0x903   : > { %1489 = vmatmul.msk.f32.vlgmr.msra.gmra.mxu2 %vm355_vm1, %v343_v28 }
 0x904   : > { %1284 = vmatpush.msra.mxu3 %v1604_v59 }
 0x905   : > { %1491 = vmatmul.msk.f32.vlgmr.msra.gmra.mxu3 %vm355_vm1, %v343_v28 }
 0x90b   : > { %1490 = vmatmul.msk.f32.gmra.mxu2 %vm355_vm1, %v344_v44 }
 0x90d   : > { %1492 = vmatmul.msk.f32.gmra.mxu3 %vm355_vm1, %v344_v44 }
 0x90e   : > { %1696 = shalt.err (!%p1693_p13)
}
 0x90f   : > { %s1788_s20 = smov 512   ;;  %s1789_s3 = smov 1024   ;;  %v934_v57 = vpop.f32.mrf.mxu2  ;;  %v957_v51 = vpop.f32.mrf.mxu3 }
 0x910   : > { %s2522_s29 = smov 32   ;;  %967 = vst [vmem:[%s1938_s12] sm:$0xff] %v934_v57  ;;  %s1319_s13 = scalar_lea.hbm %s2504_s6, %s1510_s22 }
 0x911   : > { %1519 = dma.vmem_to_hbm [thread:$0]  (%p1898_p10), %s1338_s16, 1024, %s1340_s17, %s1308_s18, %s1788_s20, %s1789_s3, %s2522_s29  }
 0x912   : > { %968 = vst [vmem:[%s1938_s12 + $0x8] sm:$0xff] %v957_v51  ;;  %s1320_s16 = sshll.u32 %s1938_s12, 4  ;;  %s1322_s17 = sshll.u32 %s1319_s13, 4  ;;  %s1321_s16 = int_to_ptr.vmem [resolvable:$true] %s1320_s16  ;;  %s1323_s17 = int_to_ptr.hbm [resolvable:$true] %s1322_s17 }
 0x913   : > { %s1303_s18 = scalar_lea.sflag [#allocation6], %s1926_s23  ;;  %s1711_s9 = sshra.s32 %s1323_s17, 4  ;;  %s1712_s9 = int_to_ptr.hbm [resolvable:$true] %s1711_s9 }
 0x914   : > { %s1713_s10 = scalar_lea.hbm %s1712_s9, 64  ;;  %s1717_s22 = scalar_lea.hbm %s2504_s6, 128 }
 0x915   : > { %p1714_p0 = scmp.ne.s32.totalorder %s1712_s9, %s1713_s10  ;;  %p1718_p7 = scmp.lt.s32.totalorder %s1712_s9, %s2504_s6 }
 0x916   : > { %p1719_p8 = scmp.lt.s32.totalorder %s1717_s22, %s1713_s10 }
 0x917   : > { %v937_v53 = vpop.f32.mrf.mxu2  ;;  %v960_v22 = vpop.f32.mrf.mxu3  ;;  %p1715_p3 = pnand %p1714_p0, %p1898_p10 }
 0x918   : > { %969 = vst [vmem:[%s1938_s12 + $0x20] sm:$0xff] %v937_v53  ;;  %p1720_p1 = por %p1719_p8, %p1718_p7 }
 0x919   : > { %970 = vst [vmem:[%s1938_s12 + $0x28] sm:$0xff] %v960_v22  ;;  %p1716_p5 = pneg %p1715_p3 }
 0x91b   : > { %p1721_p4 = pnand %p1720_p1, %p1716_p5 }
 0x986   : > { %v1263_v55 = vpop.f32.mrf.mxu2 }
 0x987   : > { %1497 = vst [vmem:[%s1938_s12 + $0x10] sm:$0xff] %v1263_v55 }
 0x988   : > { %v1286_v56 = vpop.f32.mrf.mxu3 }
 0x989   : > { %1498 = vst [vmem:[%s1938_s12 + $0x18] sm:$0xff] %v1286_v56 }
 0x98e   : > { %v1266_v58 = vpop.f32.mrf.mxu2 }
 0x98f   : > { %1499 = vst [vmem:[%s1938_s12 + $0x30] sm:$0xff] %v1266_v58 }
 0x990   : > { %v1289_v52 = vpop.f32.mrf.mxu3 }
 0x991   : > { %1500 = vst [vmem:[%s1938_s12 + $0x38] sm:$0xff] %v1289_v52 }
 0x992   : > { %1724 = shalt.err (!%p1721_p4)
}
 0x993   : > { %1518 = dma.vmem_to_hbm [thread:$0]  (%p1898_p10), %s1321_s16, 1024, %s1323_s17, %s1303_s18, %s1788_s20, %s1789_s3, %s2522_s29  }
 0x994 PF: > { %s1354_s23 = sand.u32 1, %s1759_s24   ;;  %p2523_p9 = scmp.ge.s32.totalorder %s1771_s27, 2 }
 0x995   : > { %s1355_s12 = scalar_lea.sflag [#allocation6], %s1354_s23 }
 0x996   : > { %p1531_p12 = pnand %p2523_p9, %p1865_p6 }
 0x998   : > { %p1532_p11 = pneg %p1531_p12 }
 0x99a   : > { %1750 = dma.done.wait (%p1532_p11), %s1355_s12, 1024  }
 0x99b   : > { %1752 = vsyncadd (%p1532_p11), %s1355_s12, 4294966272  ;;  %s1365_s0 = scalar_lea.sflag [#allocation11], %s1354_s23 }
 0x99c   : > { %1754 = dma.done.wait (%p1532_p11), %s1365_s0, 1024  }
 0x99d   : > { %1756 = vsyncadd (%p1532_p11), %s1365_s0, 4294966272  ;;  %s2524_s21 = sld [smem:[#allocation16_spill]]  ;;  %p25_p10 = scmp.ge.s32.totalorder %s1884_s15, 4  }
 0x99e   : > { %s2525_s24 = smov %s1763_s25  ;;  %s2526_s25 = smov %s1767_s26 }
 0x99f   : > { %s2528_s27 = smov %s1884_s15  ;;  %27 = sbr.rel (!%p25_p10) target bundleno = 11 (0xb), region = 117 }
 0x9a3   : > { %s2527_s26 = smov %s2524_s21 }
 0x9a4   :  { %1371 = vsyncpa [#allocation5], 1 }
 0x9a5   :  { %1373 = vsyncpa [#allocation5 + $0x1], 1 }
 0x9a6   :  { %1374 = vsyncpa [#allocation8], 1 }
 0x9a7   :  { %1375 = vsyncpa [#allocation6], 1 }
 0x9a8   :  { %1377 = vsyncpa [#allocation6 + $0x1], 1 }
 0x9a9   :  { %1378 = vsyncpa [#allocation11], 1 }
 0x9aa   :  { %1380 = vsyncpa [#allocation11 + $0x1], 1 }

</bundles_post_ra>
